<compile_context>
chip_gen: v7x
topology: tpu7x:2x2x1
jax: 0.10.0
libtpu: 0.0.40
codegen_flags: <defaults>
</compile_context>

<pallas_src>
import functools

import numpy as np
import jax
import jax.numpy as jnp
from jax.experimental import pallas as pl
from jax.experimental.pallas import tpu as pltpu


# ------------------------------ Pallas kernel -------------------------------

def _fused_kernel(praw_ref, s9_ref, t9_ref, wenc_ref, benc_ref,
                  wdec_ref, bdec_ref, wred_ref, bred_ref,
                  out_ref, sse_ref, *, k, m):
    tm = praw_ref.shape[0]

    # Input BN (eval affine) + ReLU on the raw patch columns (f32 math on the
    # bf16-stored patches).  This is also the `embiggen` reconstruction target.
    pb = jnp.maximum(praw_ref[...].astype(jnp.float32) * s9_ref[...]
                     + t9_ref[...], 0.0)                        # (tm, kc) f32

    # Encoder 3x3 conv as an MXU matmul (bf16 operands, f32 accumulation).
    enc = jnp.dot(pb.astype(jnp.bfloat16), wenc_ref[...],
                  preferred_element_type=jnp.float32) + benc_ref[...]  # (tm, fs)

    # In-kernel per-row k-th-largest |enc| threshold: k-step running-max
    # removal (VPU/XLU work that hides under the matmuls).  Replaces the old
    # enc -> HBM -> jax.lax.top_k -> HBM round trip.
    # TODO(synk): exact |value| ties keep all tied channels (torch.topk keeps
    # exactly k); ties have measure zero for float activations.
    a = jnp.abs(enc)
    work = a
    thr = jnp.zeros((tm, 1), jnp.float32)
    for _ in range(k):                       # k is small and static -> unrolled
        thr = jnp.max(work, axis=-1, keepdims=True)
        work = jnp.where(work >= thr, -1.0, work)
    z = jnp.where(a >= thr, enc, 0.0)
    zb = z.astype(jnp.bfloat16)

    # Main path: reducer (1x1 conv).  z never touches HBM.
    out_ref[...] = (jnp.dot(zb, wred_ref[...],
                            preferred_element_type=jnp.float32)
                    + bred_ref[...]).astype(out_ref.dtype)

    # Aux path: decoder (1x1 conv, aux-BN affine pre-folded) + ReLU, then
    # squared error vs the patch target.  Row validity is computed in-kernel
    # (no (tm,1) HBM side inputs); padded rows contribute exactly 0.
    aux = jnp.maximum(jnp.dot(zb, wdec_ref[...],
                              preferred_element_type=jnp.float32)
                      + bdec_ref[...], 0.0)
    row = (jax.lax.broadcasted_iota(jnp.int32, (tm, 1), 0)
           + pl.program_id(0) * tm)
    d = (pb - aux) * (row < m).astype(jnp.float32)

    # One partial SSE per grid block; lane 0 is read back in XLA (a full
    # 128-lane store keeps the out_spec lane-dense at negligible byte cost).
    sse_ref[...] = jnp.zeros((1, 128), jnp.float32) + jnp.sum(d * d)


# ------------------------------- glue helpers -------------------------------

def _round_up(a, b):
    return ((a + b - 1) // b) * b


def _choose_tm(m, kc, fs, out_dim, max_tm=512, min_grid=4,
               vmem_budget=20 * 1024 * 1024):
    # Rough per-row VMEM bytes: double-buffered bf16 patch block + f32 output
    # block + the in-kernel f32 temporaries (pb, |enc|/work, z, aux, d).
    # Cap tm so the working set stays well inside the scoped VMEM limit on
    # every generation (v7x: 64 MiB physical / 32 MiB scoped).  Also aim for
    # >=4 grid steps so both v7x TensorCores get >=2 steps to pipeline.
    per_row = 2 * 2 * kc + 2 * 4 * out_dim + 4 * (3 * kc + 3 * fs)
    cap = max(8, (vmem_budget // per_row) // 8 * 8)
    want = _round_up(max(8, -(-m // min_grid)), 8)
    return min(max_tm, cap, want)


def _im2col3(x):
    # x: (B, H, W, C) -> (B, H-2, W-2, C*9); columns flattened in (c, kh, kw)
    # order, matching both PyTorch OIHW conv weights and embiggen().
    # padding=0, stride=1 (module defaults).
    # TODO(synk): longer term, move this im2col into the kernel (2-row-halo
    # tiles + 9 shifted VMEM views) so the 9x-expanded patch matrix is never
    # materialized in HBM.
    b, h, w, c = x.shape
    ho, wo = h - 2, w - 2
    cols = []
    for kh in range(3):
        for kw in range(3):
            cols.append(x[:, kh:kh + ho, kw:kw + wo, :])
    p = jnp.stack(cols, axis=-1)               # (b, ho, wo, c, 9)
    return p.reshape(b, ho, wo, c * 9), ho, wo


def _conv_init(key, cout, cin, ksize):
    kw_, kb_ = jax.random.split(key)
    fan_in = cin * ksize * ksize
    bound = 1.0 / np.sqrt(fan_in)
    w = jax.random.uniform(kw_, (cout, cin, ksize, ksize), jnp.float32,
                           -bound, bound)
    b = jax.random.uniform(kb_, (cout,), jnp.float32, -bound, bound)
    return w, b


def init_params(in_dim, out_dim, filterset_size, k, key, eps=1e-5):
    """Unpadded, bf16 weight matrices with all constant BN affines pre-folded."""
    kc = in_dim * 9
    fs = filterset_size
    assert 1 <= k <= fs, "TopK needs 1 <= k <= filterset_size"
    k1, k2, k3 = jax.random.split(key, 3)

    w_enc, b_enc = _conv_init(k1, fs, in_dim, 3)       # Conv2d(in, fs, 3)
    w_dec, b_dec = _conv_init(k2, kc, fs, 1)           # Conv2d(fs, in*9, 1)
    w_red, b_red = _conv_init(k3, out_dim, fs, 1)      # Conv2d(fs, out, 1)

    # Eval-mode BatchNorm affines (PyTorch default init).
    bn_scale = jnp.full((in_dim,), 1.0 / np.sqrt(1.0 + eps), jnp.float32)
    bn_shift = jnp.zeros((in_dim,), jnp.float32)
    abn_scale = jnp.full((kc,), 1.0 / np.sqrt(1.0 + eps), jnp.float32)
    abn_shift = jnp.zeros((kc,), jnp.float32)

    # OIHW -> matmul matrices, (c, kh, kw)-major to match im2col columns.
    wenc = w_enc.reshape(fs, kc).T                     # (kc, fs)
    wdec = w_dec.reshape(kc, fs).T                     # (fs, kc)
    wred = w_red.reshape(out_dim, fs).T                # (fs, out_dim)

    # Fold the aux BatchNorm (constant affine) into the decoder.
    wdec_f = wdec * abn_scale[None, :]
    bdec_f = b_dec * abn_scale + abn_shift

    return {
        "wenc": wenc.astype(jnp.bfloat16),
        "benc": b_enc.reshape(1, fs),
        "wdec": wdec_f.astype(jnp.bfloat16),
        "bdec": bdec_f.reshape(1, kc),
        "wred": wred.astype(jnp.bfloat16),
        "bred": b_red.reshape(1, out_dim),
        # Input BN affine broadcast to patch columns (column j <- channel j//9).
        "s9": jnp.repeat(bn_scale, 9).reshape(1, kc),
        "t9": jnp.repeat(bn_shift, 9).reshape(1, kc),
        "in_dim": in_dim, "out_dim": out_dim, "fs": fs, "k": k,
    }


# ------------------------------ module forward ------------------------------

def forward(x_nchw, p):
    """Returns (out_nchw, aux_loss), matching SparseCodingLayer_AfterConv."""
    in_dim, out_dim, fs, k = p["in_dim"], p["out_dim"], p["fs"], p["k"]
    kc = in_dim * 9

    x = jnp.transpose(x_nchw, (0, 2, 3, 1)).astype(jnp.float32)   # NCHW->NHWC
    praw, ho, wo = _im2col3(x)                                    # raw patches
    b = x.shape[0]
    m = b * ho * wo
    praw = praw.reshape(m, kc).astype(jnp.bfloat16)

    tm = _choose_tm(m, kc, fs, out_dim)
    mp = _round_up(m, tm)
    nblk = mp // tm
    if mp != m:
        # Padded rows are zeros; the kernel's in-kernel row mask zeroes their
        # SSE contribution and the main output rows are sliced away below.
        praw = jnp.pad(praw, ((0, mp - m), (0, 0)))

    kernel = functools.partial(_fused_kernel, k=k, m=m)

    out_p, sse_part = pl.pallas_call(
        kernel,
        out_shape=(jax.ShapeDtypeStruct((mp, out_dim), jnp.float32),
                   jax.ShapeDtypeStruct((1, nblk * 128), jnp.float32)),
        grid=(nblk,),
        in_specs=[pl.BlockSpec((tm, kc), lambda i: (i, 0)),       # patches bf16
                  pl.BlockSpec((1, kc), lambda i: (0, 0)),        # bn scale x9
                  pl.BlockSpec((1, kc), lambda i: (0, 0)),        # bn shift x9
                  pl.BlockSpec((kc, fs), lambda i: (0, 0)),       # wenc bf16
                  pl.BlockSpec((1, fs), lambda i: (0, 0)),        # benc
                  pl.BlockSpec((fs, kc), lambda i: (0, 0)),       # wdec bf16
                  pl.BlockSpec((1, kc), lambda i: (0, 0)),        # bdec
                  pl.BlockSpec((fs, out_dim), lambda i: (0, 0)),  # wred bf16
                  pl.BlockSpec((1, out_dim), lambda i: (0, 0))],  # bred
        out_specs=(pl.BlockSpec((tm, out_dim), lambda i: (i, 0)),
                   pl.BlockSpec((1, 128), lambda i: (0, i))),
        compiler_params=pltpu.CompilerParams(
            dimension_semantics=("parallel",),
            vmem_limit_bytes=32 * 1024 * 1024),
    )(praw, p["s9"], p["t9"], p["wenc"], p["benc"],
      p["wdec"], p["bdec"], p["wred"], p["bred"])

    # MSELoss(reduction='mean') over the real B * (C*9) * Ho * Wo elements.
    aux_loss = jnp.sum(sse_part.reshape(nblk, 128)[:, 0]) / float(m * kc)

    out = out_p[:m].reshape(b, ho, wo, out_dim)
    out = jnp.transpose(out, (0, 3, 1, 2))                        # NHWC->NCHW
    return out, aux_loss


# ----------------------------------- demo -----------------------------------

if __name__ == "__main__":
    in_dim, out_dim, filterset_size, k = 4, 8, 32, 8
    key = jax.random.PRNGKey(0)
    kp_key, kx_key = jax.random.split(key)
    params = init_params(in_dim, out_dim, filterset_size, k, kp_key)

    x = jax.random.normal(kx_key, (2, in_dim, 16, 16), jnp.float32)

    fwd = jax.jit(lambda xx: forward(xx, params))
    out, aux_loss = fwd(x)
    jax.block_until_ready((out, aux_loss))

    assert out.shape == (2, out_dim, 14, 14)
    assert aux_loss.shape == ()
    assert bool(jnp.isfinite(aux_loss))
    print("KERNEL_OK")
</pallas_src>

<mosaic_0001>
module attributes {stable_mosaic.version = 11 : i64} {
  func.func @_fused_kernel(%arg0: i32, %arg1: memref<104x36xbf16, #tpu.memory_space<vmem>>, %arg2: memref<1x36xf32, #tpu.memory_space<vmem>>, %arg3: memref<1x36xf32, #tpu.memory_space<vmem>>, %arg4: memref<36x32xbf16, #tpu.memory_space<vmem>>, %arg5: memref<1x32xf32, #tpu.memory_space<vmem>>, %arg6: memref<32x36xbf16, #tpu.memory_space<vmem>>, %arg7: memref<1x36xf32, #tpu.memory_space<vmem>>, %arg8: memref<32x8xbf16, #tpu.memory_space<vmem>>, %arg9: memref<1x8xf32, #tpu.memory_space<vmem>>, %arg10: memref<104x8xf32, #tpu.memory_space<vmem>>, %arg11: memref<1x128xf32, #tpu.memory_space<vmem>>) attributes {dimension_semantics = [#tpu.dimension_semantics<parallel>], iteration_bounds = array<i64: 4>, scalar_prefetch = 0 : i64, scratch_operands = 0 : i64, tpu.core_type = #tpu.core_type<tc>, window_params = [{transform_indices = @transform_0, window_bounds = array<i64: 104, 36>}, {pipeline_mode = #tpu.pipeline_mode<synchronous>, transform_indices = @transform_1, window_bounds = array<i64: 1, 36>}, {pipeline_mode = #tpu.pipeline_mode<synchronous>, transform_indices = @transform_2, window_bounds = array<i64: 1, 36>}, {pipeline_mode = #tpu.pipeline_mode<synchronous>, transform_indices = @transform_3, window_bounds = array<i64: 36, 32>}, {pipeline_mode = #tpu.pipeline_mode<synchronous>, transform_indices = @transform_4, window_bounds = array<i64: 1, 32>}, {pipeline_mode = #tpu.pipeline_mode<synchronous>, transform_indices = @transform_5, window_bounds = array<i64: 32, 36>}, {pipeline_mode = #tpu.pipeline_mode<synchronous>, transform_indices = @transform_6, window_bounds = array<i64: 1, 36>}, {pipeline_mode = #tpu.pipeline_mode<synchronous>, transform_indices = @transform_7, window_bounds = array<i64: 32, 8>}, {pipeline_mode = #tpu.pipeline_mode<synchronous>, transform_indices = @transform_8, window_bounds = array<i64: 1, 8>}, {transform_indices = @transform_9, window_bounds = array<i64: 104, 8>}, {transform_indices = @transform_10, window_bounds = array<i64: 1, 128>}]} {
    %c0 = arith.constant 0 : index
    %c0_0 = arith.constant 0 : index
    %0 = vector.load %arg1[%c0, %c0_0] : memref<104x36xbf16, #tpu.memory_space<vmem>>, vector<104x36xbf16>
    %1 = arith.extf %0 : vector<104x36xbf16> to vector<104x36xf32>
    %c0_1 = arith.constant 0 : index
    %c0_2 = arith.constant 0 : index
    %2 = vector.load %arg2[%c0_1, %c0_2] : memref<1x36xf32, #tpu.memory_space<vmem>>, vector<1x36xf32>
    %3 = vector.broadcast %2 : vector<1x36xf32> to vector<104x36xf32>
    %4 = arith.mulf %1, %3 : vector<104x36xf32>
    %c0_3 = arith.constant 0 : index
    %c0_4 = arith.constant 0 : index
    %5 = vector.load %arg3[%c0_3, %c0_4] : memref<1x36xf32, #tpu.memory_space<vmem>>, vector<1x36xf32>
    %6 = vector.broadcast %5 : vector<1x36xf32> to vector<104x36xf32>
    %7 = arith.addf %4, %6 : vector<104x36xf32>
    %cst = arith.constant 0.000000e+00 : f32
    %8 = vector.broadcast %cst : f32 to vector<104x36xf32>
    %9 = arith.maximumf %7, %8 : vector<104x36xf32>
    %10 = arith.truncf %9 : vector<104x36xf32> to vector<104x36xbf16>
    %c0_5 = arith.constant 0 : index
    %c0_6 = arith.constant 0 : index
    %11 = vector.load %arg4[%c0_5, %c0_6] : memref<36x32xbf16, #tpu.memory_space<vmem>>, vector<36x32xbf16>
    %cst_7 = arith.constant dense<0.000000e+00> : vector<104x32xf32>
    %12 = tpu.matmul %10, %11, %cst_7 {dimension_numbers = #tpu.dot_dimension_numbers<[1], [0], [0], [1], [0, 0, 1, 1], [], []>} : vector<104x36xbf16>, vector<36x32xbf16>, vector<104x32xf32> -> vector<104x32xf32>
    %c0_8 = arith.constant 0 : index
    %c0_9 = arith.constant 0 : index
    %13 = vector.load %arg5[%c0_8, %c0_9] : memref<1x32xf32, #tpu.memory_space<vmem>>, vector<1x32xf32>
    %14 = vector.broadcast %13 : vector<1x32xf32> to vector<104x32xf32>
    %15 = arith.addf %12, %14 : vector<104x32xf32>
    %16 = math.absf %15 : vector<104x32xf32>
    %cst_10 = arith.constant dense<0xFF800000> : vector<104xf32>
    %17 = vector.multi_reduction <maximumf>, %16, %cst_10 [1] : vector<104x32xf32> to vector<104xf32>
    %18 = vector.shape_cast %17 : vector<104xf32> to vector<104x1xf32>
    %19 = vector.broadcast %18 : vector<104x1xf32> to vector<104x32xf32>
    %20 = arith.cmpf oge, %16, %19 : vector<104x32xf32>
    %cst_11 = arith.constant -1.000000e+00 : f32
    %21 = vector.broadcast %cst_11 : f32 to vector<104x32xf32>
    %22 = arith.select %20, %21, %16 : vector<104x32xi1>, vector<104x32xf32>
    %cst_12 = arith.constant dense<0xFF800000> : vector<104xf32>
    %23 = vector.multi_reduction <maximumf>, %22, %cst_12 [1] : vector<104x32xf32> to vector<104xf32>
    %24 = vector.shape_cast %23 : vector<104xf32> to vector<104x1xf32>
    %25 = vector.broadcast %24 : vector<104x1xf32> to vector<104x32xf32>
    %26 = arith.cmpf oge, %22, %25 : vector<104x32xf32>
    %cst_13 = arith.constant -1.000000e+00 : f32
    %27 = vector.broadcast %cst_13 : f32 to vector<104x32xf32>
    %28 = arith.select %26, %27, %22 : vector<104x32xi1>, vector<104x32xf32>
    %cst_14 = arith.constant dense<0xFF800000> : vector<104xf32>
    %29 = vector.multi_reduction <maximumf>, %28, %cst_14 [1] : vector<104x32xf32> to vector<104xf32>
    %30 = vector.shape_cast %29 : vector<104xf32> to vector<104x1xf32>
    %31 = vector.broadcast %30 : vector<104x1xf32> to vector<104x32xf32>
    %32 = arith.cmpf oge, %28, %31 : vector<104x32xf32>
    %cst_15 = arith.constant -1.000000e+00 : f32
    %33 = vector.broadcast %cst_15 : f32 to vector<104x32xf32>
    %34 = arith.select %32, %33, %28 : vector<104x32xi1>, vector<104x32xf32>
    %cst_16 = arith.constant dense<0xFF800000> : vector<104xf32>
    %35 = vector.multi_reduction <maximumf>, %34, %cst_16 [1] : vector<104x32xf32> to vector<104xf32>
    %36 = vector.shape_cast %35 : vector<104xf32> to vector<104x1xf32>
    %37 = vector.broadcast %36 : vector<104x1xf32> to vector<104x32xf32>
    %38 = arith.cmpf oge, %34, %37 : vector<104x32xf32>
    %cst_17 = arith.constant -1.000000e+00 : f32
    %39 = vector.broadcast %cst_17 : f32 to vector<104x32xf32>
    %40 = arith.select %38, %39, %34 : vector<104x32xi1>, vector<104x32xf32>
    %cst_18 = arith.constant dense<0xFF800000> : vector<104xf32>
    %41 = vector.multi_reduction <maximumf>, %40, %cst_18 [1] : vector<104x32xf32> to vector<104xf32>
    %42 = vector.shape_cast %41 : vector<104xf32> to vector<104x1xf32>
    %43 = vector.broadcast %42 : vector<104x1xf32> to vector<104x32xf32>
    %44 = arith.cmpf oge, %40, %43 : vector<104x32xf32>
    %cst_19 = arith.constant -1.000000e+00 : f32
    %45 = vector.broadcast %cst_19 : f32 to vector<104x32xf32>
    %46 = arith.select %44, %45, %40 : vector<104x32xi1>, vector<104x32xf32>
    %cst_20 = arith.constant dense<0xFF800000> : vector<104xf32>
    %47 = vector.multi_reduction <maximumf>, %46, %cst_20 [1] : vector<104x32xf32> to vector<104xf32>
    %48 = vector.shape_cast %47 : vector<104xf32> to vector<104x1xf32>
    %49 = vector.broadcast %48 : vector<104x1xf32> to vector<104x32xf32>
    %50 = arith.cmpf oge, %46, %49 : vector<104x32xf32>
    %cst_21 = arith.constant -1.000000e+00 : f32
    %51 = vector.broadcast %cst_21 : f32 to vector<104x32xf32>
    %52 = arith.select %50, %51, %46 : vector<104x32xi1>, vector<104x32xf32>
    %cst_22 = arith.constant dense<0xFF800000> : vector<104xf32>
    %53 = vector.multi_reduction <maximumf>, %52, %cst_22 [1] : vector<104x32xf32> to vector<104xf32>
    %54 = vector.shape_cast %53 : vector<104xf32> to vector<104x1xf32>
    %55 = vector.broadcast %54 : vector<104x1xf32> to vector<104x32xf32>
    %56 = arith.cmpf oge, %52, %55 : vector<104x32xf32>
    %cst_23 = arith.constant -1.000000e+00 : f32
    %57 = vector.broadcast %cst_23 : f32 to vector<104x32xf32>
    %58 = arith.select %56, %57, %52 : vector<104x32xi1>, vector<104x32xf32>
    %cst_24 = arith.constant dense<0xFF800000> : vector<104xf32>
    %59 = vector.multi_reduction <maximumf>, %58, %cst_24 [1] : vector<104x32xf32> to vector<104xf32>
    %60 = vector.shape_cast %59 : vector<104xf32> to vector<104x1xf32>
    %61 = vector.broadcast %60 : vector<104x1xf32> to vector<104x32xf32>
    %62 = arith.cmpf oge, %16, %61 : vector<104x32xf32>
    %cst_25 = arith.constant 0.000000e+00 : f32
    %63 = vector.broadcast %cst_25 : f32 to vector<104x32xf32>
    %64 = arith.select %62, %15, %63 : vector<104x32xi1>, vector<104x32xf32>
    %65 = arith.truncf %64 : vector<104x32xf32> to vector<104x32xbf16>
    %c0_26 = arith.constant 0 : index
    %c0_27 = arith.constant 0 : index
    %66 = vector.load %arg8[%c0_26, %c0_27] : memref<32x8xbf16, #tpu.memory_space<vmem>>, vector<32x8xbf16>
    %cst_28 = arith.constant dense<0.000000e+00> : vector<104x8xf32>
    %67 = tpu.matmul %65, %66, %cst_28 {dimension_numbers = #tpu.dot_dimension_numbers<[1], [0], [0], [1], [0, 0, 1, 1], [], []>} : vector<104x32xbf16>, vector<32x8xbf16>, vector<104x8xf32> -> vector<104x8xf32>
    %c0_29 = arith.constant 0 : index
    %c0_30 = arith.constant 0 : index
    %68 = vector.load %arg9[%c0_29, %c0_30] : memref<1x8xf32, #tpu.memory_space<vmem>>, vector<1x8xf32>
    %69 = vector.broadcast %68 : vector<1x8xf32> to vector<104x8xf32>
    %70 = arith.addf %67, %69 : vector<104x8xf32>
    %c0_31 = arith.constant 0 : index
    %c0_32 = arith.constant 0 : index
    %71 = vector.load %arg10[%c0_31, %c0_32] : memref<104x8xf32, #tpu.memory_space<vmem>>, vector<104x8xf32>
    tpu.vector_store %arg10[%c0_31, %c0_32], %70 {strides = array<i32>} : memref<104x8xf32, #tpu.memory_space<vmem>>, vector<104x8xf32>,
    %c0_33 = arith.constant 0 : index
    %c0_34 = arith.constant 0 : index
    %72 = vector.load %arg6[%c0_33, %c0_34] : memref<32x36xbf16, #tpu.memory_space<vmem>>, vector<32x36xbf16>
    %cst_35 = arith.constant dense<0.000000e+00> : vector<104x36xf32>
    %73 = tpu.matmul %65, %72, %cst_35 {dimension_numbers = #tpu.dot_dimension_numbers<[1], [0], [0], [1], [0, 0, 1, 1], [], []>} : vector<104x32xbf16>, vector<32x36xbf16>, vector<104x36xf32> -> vector<104x36xf32>
    %c0_36 = arith.constant 0 : index
    %c0_37 = arith.constant 0 : index
    %74 = vector.load %arg7[%c0_36, %c0_37] : memref<1x36xf32, #tpu.memory_space<vmem>>, vector<1x36xf32>
    %75 = vector.broadcast %74 : vector<1x36xf32> to vector<104x36xf32>
    %76 = arith.addf %73, %75 : vector<104x36xf32>
    %cst_38 = arith.constant 0.000000e+00 : f32
    %77 = vector.broadcast %cst_38 : f32 to vector<104x36xf32>
    %78 = arith.maximumf %76, %77 : vector<104x36xf32>
    %79 = tpu.iota {dimensions = array<i32: 0>} : vector<104x1xi32>
    %c104_i32 = arith.constant 104 : i32
    %80 = arith.muli %arg0, %c104_i32 : i32
    %81 = vector.broadcast %80 : i32 to vector<104x1xi32>
    %82 = arith.addi %79, %81 : vector<104x1xi32>
    %83 = arith.subf %9, %78 : vector<104x36xf32>
    %c392_i32 = arith.constant 392 : i32
    %84 = vector.broadcast %c392_i32 : i32 to vector<104x1xi32>
    %85 = arith.cmpi slt, %82, %84 : vector<104x1xi32>
    %86 = arith.extui %85 : vector<104x1xi1> to vector<104x1xi32>
    %87 = arith.sitofp %86 : vector<104x1xi32> to vector<104x1xf32>
    %88 = vector.broadcast %87 : vector<104x1xf32> to vector<104x36xf32>
    %89 = arith.mulf %83, %88 : vector<104x36xf32>
    %cst_39 = arith.constant 0.000000e+00 : f32
    %90 = vector.broadcast %cst_39 : f32 to vector<1x128xf32>
    %91 = arith.mulf %89, %89 : vector<104x36xf32>
    %92 = vector.shape_cast %91 : vector<104x36xf32> to vector<1x104x36xf32>
    %cst_40 = arith.constant dense<0.000000e+00> : vector<1xf32>
    %93 = vector.multi_reduction <add>, %92, %cst_40 [1, 2] : vector<1x104x36xf32> to vector<1xf32>
    %94 = vector.shape_cast %93 : vector<1xf32> to vector<1x1x1xf32>
    %95 = vector.extract %94[0, 0, 0] : f32 from vector<1x1x1xf32>
    %96 = vector.broadcast %95 : f32 to vector<1x128xf32>
    %97 = arith.addf %90, %96 : vector<1x128xf32>
    %c0_41 = arith.constant 0 : index
    %c0_42 = arith.constant 0 : index
    %98 = vector.load %arg11[%c0_41, %c0_42] : memref<1x128xf32, #tpu.memory_space<vmem>>, vector<1x128xf32>
    tpu.vector_store %arg11[%c0_41, %c0_42], %97 {strides = array<i32>} : memref<1x128xf32, #tpu.memory_space<vmem>>, vector<1x128xf32>,
    return
  }
  func.func @transform_0(%arg0: i32) -> (i32, i32) {
    %c0_i32 = arith.constant 0 : i32
    %c0_i32_0 = arith.constant 0 : i32
    return %arg0, %c0_i32 : i32, i32
  }
  func.func @transform_1(%arg0: i32) -> (i32, i32) {
    %c0_i32 = arith.constant 0 : i32
    %c0_i32_0 = arith.constant 0 : i32
    %c0_i32_1 = arith.constant 0 : i32
    return %c0_i32, %c0_i32_0 : i32, i32
  }
  func.func @transform_2(%arg0: i32) -> (i32, i32) {
    %c0_i32 = arith.constant 0 : i32
    %c0_i32_0 = arith.constant 0 : i32
    %c0_i32_1 = arith.constant 0 : i32
    return %c0_i32, %c0_i32_0 : i32, i32
  }
  func.func @transform_3(%arg0: i32) -> (i32, i32) {
    %c0_i32 = arith.constant 0 : i32
    %c0_i32_0 = arith.constant 0 : i32
    %c0_i32_1 = arith.constant 0 : i32
    return %c0_i32, %c0_i32_0 : i32, i32
  }
  func.func @transform_4(%arg0: i32) -> (i32, i32) {
    %c0_i32 = arith.constant 0 : i32
    %c0_i32_0 = arith.constant 0 : i32
    %c0_i32_1 = arith.constant 0 : i32
    return %c0_i32, %c0_i32_0 : i32, i32
  }
  func.func @transform_5(%arg0: i32) -> (i32, i32) {
    %c0_i32 = arith.constant 0 : i32
    %c0_i32_0 = arith.constant 0 : i32
    %c0_i32_1 = arith.constant 0 : i32
    return %c0_i32, %c0_i32_0 : i32, i32
  }
  func.func @transform_6(%arg0: i32) -> (i32, i32) {
    %c0_i32 = arith.constant 0 : i32
    %c0_i32_0 = arith.constant 0 : i32
    %c0_i32_1 = arith.constant 0 : i32
    return %c0_i32, %c0_i32_0 : i32, i32
  }
  func.func @transform_7(%arg0: i32) -> (i32, i32) {
    %c0_i32 = arith.constant 0 : i32
    %c0_i32_0 = arith.constant 0 : i32
    %c0_i32_1 = arith.constant 0 : i32
    return %c0_i32, %c0_i32_0 : i32, i32
  }
  func.func @transform_8(%arg0: i32) -> (i32, i32) {
    %c0_i32 = arith.constant 0 : i32
    %c0_i32_0 = arith.constant 0 : i32
    %c0_i32_1 = arith.constant 0 : i32
    return %c0_i32, %c0_i32_0 : i32, i32
  }
  func.func @transform_9(%arg0: i32) -> (i32, i32) {
    %c0_i32 = arith.constant 0 : i32
    %c0_i32_0 = arith.constant 0 : i32
    return %arg0, %c0_i32 : i32, i32
  }
  func.func @transform_10(%arg0: i32) -> (i32, i32) {
    %c0_i32 = arith.constant 0 : i32
    %c0_i32_0 = arith.constant 0 : i32
    return %c0_i32, %arg0 : i32, i32
  }
}

</mosaic_0001>

<bundles_post_ra>
// kernel: _lambda_.1
= control target key start
LH: loop header
LB: loop body
LE: loop exit
PB: predicated region body
PF: predicated region fallthrough
CT: control target
= control target key end

     0   :  { %s1934_s13 = smov 0   ;;  %s2943_s0 = inlined_call_operand.vmem [shape: bf16[416,36], index: 0, kind: input, shape index: {}]   ;;  %s2944_s1 = inlined_call_operand.vmem [shape: f32[1,36], index: 1, kind: input, shape index: {}]   ;;  %s2945_s2 = inlined_call_operand.vmem [shape: f32[1,36], index: 2, kind: input, shape index: {}]   ;;  %s2946_s3 = inlined_call_operand.vmem [shape: bf16[36,32], index: 3, kind: input, shape index: {}]   ;;  %s2947_s4 = inlined_call_operand.vmem [shape: f32[1,32], index: 4, kind: input, shape index: {}]   ;;  %s2948_s5 = inlined_call_operand.vmem [shape: bf16[32,36], index: 5, kind: input, shape index: {}]   ;;  %s2949_s6 = inlined_call_operand.vmem [shape: f32[1,36], index: 6, kind: input, shape index: {}]   ;;  %s2950_s7 = inlined_call_operand.vmem [shape: bf16[32,8], index: 7, kind: input, shape index: {}]   ;;  %s2951_s8 = inlined_call_operand.vmem [shape: f32[1,8], index: 8, kind: input, shape index: {}]   ;;  %s2952_s9 = inlined_call_operand.vmem [shape: f32[416,8], index: 9, kind: output, shape index: {0}]   ;;  %s2953_s10 = inlined_call_operand.vmem [shape: f32[1,512], index: 10, kind: output, shape index: {1}]  }
   0x1 LB: > { %s1940_s14 = sadd.s32 4294967295, %s1875_s13   ;;  %p1640_p0 = scmp.ge.s32.totalorder %s1875_s13, 1  ;;  %s1875_s13 = sphi %s1934_s13, %s21_s13  }
   0x2   : > { %p316_p1 = scmp.lt.s32.totalorder %s1875_s13, 5 }
   0x4   : > { %p317_p2 = pnand %p1640_p0, %p316_p1 }
   0x5   : > { %v1862_v0 = vld [vmem:[%s2946_s3] sm:$0xff] (!%p317_p2)   ;;  %v1877_v1 = vmov (!%p317_p2), 0.0   ;;  %v1863_v2 = vld [vmem:[%s2946_s3 + $0x8] sm:$0xff] (!%p317_p2)   ;;  %v1864_v3 = vld [vmem:[%s2946_s3 + $0x10] ss:$0 sps:$4 sm:$0x33] (!%p317_p2)  }
   0x6   : > { %320 = sbr.rel (%p317_p2) target bundleno = 1944 (0x798), region = 56  ;;  %1748 = vmatprep.subr.bf16.mxu0 (!%p317_p2), %v1877_v1  ;;  %1846 = vmatprep.subr.bf16.mxu1 (!%p317_p2), %v1877_v1  ;;  %vm1878_vm0 = vmmov (!%p317_p2), 0   ;;  %vm508_vm1 = vcmask (!%p317_p2), 1041408   ;;  %v1974_v6 = vld [vmem:[%s2944_s1] ss:$0 sm:$0xff] (!%p317_p2)  ;;  %vm486_vm2 = vcmask (!%p317_p2), 293888  }
   0x7   : > { %1749 = vmatpush3.bf16.msra.mxu0 (!%p317_p2), %v1862_v0  ;;  %1754 = vmatprep.mubr.msk.bf16.mxu0 (!%p317_p2), %vm1878_vm0, %v1877_v1  ;;  %s357_s21 = smul.u32 (!%p317_p2), 13, %s1940_s14  ;;  %v510_v4 = vsel (!%p317_p2), %vm508_vm1, %v1864_v3, 0  ;;  %v1981_v12 = vld [vmem:[%s2945_s2] ss:$0 sm:$0xff] (!%p317_p2)  ;;  %vm613_vm3 = vcmask (!%p317_p2), 261120   ;;  %p369_p4 = scmp.lt.s32.totalorder (!%p317_p2), %s1940_s14, 3 }
   0x8   : > { %1750 = vmatprep.subr.bf16.mxu0 (!%p317_p2), %v1877_v1  ;;  %1798 = vmatprep.mubr.msk.bf16.mxu1 (!%p317_p2), %vm1878_vm0, %v1877_v1 }
   0x9   : > { %p358_p3 = scmp.lt.s32.totalorder (!%p317_p2), %s357_s21, 51 }
   0xb   : > { %1751 = vmatpush3.bf16.msra.mxu0 (!%p317_p2), %v1863_v2 }
   0xc   : > { %1752 = vmatprep.subr.bf16.mxu0 (!%p317_p2), %v1877_v1 }
   0xd   : > { %s2975_s21 = smov (!%p358_p3, %s357_s21), 51 }
   0xe   : > { %s1641_s22 = sshll.u32 %s2975_s21, 2  ;;  %s1642_s23 = sshll.u32 %s2975_s21, 3 }
   0xf   : > { %1753 = vmatpush3.bf16.msra.mxu0 %v510_v4  ;;  %s1968_s25 = scalar_lea.vmem %s2943_s0, %s1641_s22  ;;  %s2793_s28 = scalar_lea.vmem %s2952_s9, %s1642_s23 }
  0x10   : > { %v1692_v5 = vld [vmem:[%s1968_s25] sm:$0xff]   ;;  %v1715_v7 = vld [vmem:[%s1968_s25 + $0x8] sm:$0xff]   ;;  %1782 = vmatprep.subr.bf16.mxu0 %v1877_v1  ;;  %v1716_v17 = vld [vmem:[%s1968_s25 + $0x10] sm:$0xff]   ;;  %s1425_s21 = smul.u32 104, %s1940_s14  ;;  %s2977_s14 = smov (!%p369_p4, %s1940_s14), 3 }
  0x11   : > { %v1693_v8 = vunpack.c.l.bf16 %v1692_v5  ;;  %v1694_v9 = vunpack.c.h.bf16 %v1692_v5  ;;  %v1697_v10 = vunpack.c.l.bf16 %v1715_v7  ;;  %v1698_v11 = vunpack.c.h.bf16 %v1715_v7  ;;  %v1717_v31 = vld [vmem:[%s1968_s25 + $0x18] sm:$0xff]   ;;  %v1718_v41 = vld [vmem:[%s1968_s25 + $0x20] sm:$0xff]   ;;  %v1719_v51 = vld [vmem:[%s1968_s25 + $0x28] sm:$0xff]   ;;  %s371_s15 = scalar_lea.vmem %s2953_s10, %s2977_s14 }
  0x12   : > { %v1701_v20 = vunpack.c.l.bf16 %v1716_v17  ;;  %v1702_v21 = vunpack.c.h.bf16 %v1716_v17  ;;  %v1705_v32 = vunpack.c.l.bf16 %v1717_v31  ;;  %v1706_v33 = vunpack.c.h.bf16 %v1717_v31  ;;  %v385_v61 = vld [vmem:[%s1968_s25 + $0x30] sm:$0xf] }
  0x13   : > { %v406_v13 = vmul.f32 %v1693_v8, %v1974_v6  ;;  %v407_v14 = vmul.f32 %v1694_v9, %v1974_v6  ;;  %v408_v15 = vmul.f32 %v1697_v10, %v1974_v6  ;;  %v409_v16 = vmul.f32 %v1698_v11, %v1974_v6 }
  0x14   : > { %v410_v29 = vmul.f32 %v1701_v20, %v1974_v6  ;;  %v411_v30 = vmul.f32 %v1702_v21, %v1974_v6  ;;  %v412_v37 = vmul.f32 %v1705_v32, %v1974_v6  ;;  %v413_v38 = vmul.f32 %v1706_v33, %v1974_v6 }
  0x15   : > { %v1989_v18 = vadd.f32 %v1981_v12, %v406_v13  ;;  %v1992_v19 = vadd.f32 %v1981_v12, %v407_v14  ;;  %v1997_v24 = vadd.f32 %v1981_v12, %v408_v15  ;;  %v2000_v25 = vadd.f32 %v1981_v12, %v409_v16 }
  0x16   : > { %v2019_v35 = vadd.f32 %v1981_v12, %v410_v29  ;;  %v2022_v36 = vadd.f32 %v1981_v12, %v411_v30  ;;  %v2033_v42 = vadd.f32 %v1981_v12, %v412_v37  ;;  %v2036_v43 = vadd.f32 %v1981_v12, %v413_v38  ;;  %v1645_v30 = vld [vmem:[%s2947_s4] ss:$0 sm:$0xff] }
  0x17   : > { %v439_v22 = vmax.f32 %v1989_v18, 0.0  ;;  %v440_v23 = vmax.f32 %v1992_v19, 0.0  ;;  %v2963_v27 = vmax.f32 %v1997_v24, 0.0  ;;  %v2962_v28 = vmax.f32 %v2000_v25, 0.0 }
  0x18   : > { %v2961_v39 = vmax.f32 %v2019_v35, 0.0  ;;  %v2960_v40 = vmax.f32 %v2022_v36, 0.0  ;;  %v1709_v45 = vunpack.c.l.bf16 %v1718_v41  ;;  %v1710_v46 = vunpack.c.h.bf16 %v1718_v41 }
  0x19   : > { %v452_v26 = vpack.c.bf16 %v440_v23, %v439_v22  ;;  %v453_v34 = vpack.c.bf16 %v2962_v28, %v2963_v27  ;;  %v2959_v47 = vmax.f32 %v2033_v42, 0.0  ;;  %v2958_v48 = vmax.f32 %v2036_v43, 0.0 }
  0x1a   : > { %v454_v44 = vpack.c.bf16 %v2960_v40, %v2961_v39  ;;  %v414_v49 = vmul.f32 %v1709_v45, %v1974_v6  ;;  %v415_v50 = vmul.f32 %v1710_v46, %v1974_v6  ;;  %v1713_v55 = vunpack.c.l.bf16 %v1719_v51 }
  0x1b   : > { %1755 = vmatmul.mubr.msk.bf16.vlgmr.msra.gmra.mrb[0].mxu0 %vm486_vm2, %v452_v26  ;;  %v455_v52 = vpack.c.bf16 %v2958_v48, %v2959_v47  ;;  %v1714_v56 = vunpack.c.h.bf16 %v1719_v51  ;;  %v398_v2 = vunpack.c.l.bf16 %v385_v61 }
  0x1c   : > { %1758 = vmatprep.mubr.msk.bf16.mxu0 %vm1878_vm0, %v1877_v1  ;;  %v2055_v53 = vadd.f32 %v1981_v12, %v414_v49  ;;  %v2058_v54 = vadd.f32 %v1981_v12, %v415_v50  ;;  %v416_v59 = vmul.f32 %v1713_v55, %v1974_v6 }
  0x1d   : > { %v417_v60 = vmul.f32 %v1714_v56, %v1974_v6  ;;  %v418_v5 = vmul.f32 %v1974_v6, %v398_v2 }
  0x1e   : > { %v2957_v57 = vmax.f32 %v2055_v53, 0.0  ;;  %v2956_v58 = vmax.f32 %v2058_v54, 0.0  ;;  %v2073_v63 = vadd.f32 %v1981_v12, %v416_v59 }
  0x1f   : > { %v2076_v0 = vadd.f32 %v1981_v12, %v417_v60  ;;  %v438_v8 = vadd.f32 %v1981_v12, %v418_v5 }
  0x20   : > { %v456_v62 = vpack.c.bf16 %v2956_v58, %v2957_v57  ;;  %v2955_v3 = vmax.f32 %v2073_v63, 0.0 }
  0x21   : > { %v2954_v4 = vmax.f32 %v2076_v0, 0.0  ;;  %v2090_v9 = vmax.f32 %v438_v8, 0.0 }
  0x23   : > { %1759 = vmatmul.mubr.msk.bf16.gmra.mrb[4].mxu0 %vm486_vm2, %v453_v34  ;;  %v457_v7 = vpack.c.bf16 %v2954_v4, %v2955_v3  ;;  %v458_v6 = vpack.c.bf16 %v2090_v9, %v2090_v9 }
  0x24   : > { %1762 = vmatprep.mubr.msk.bf16.mxu0 %vm1878_vm0, %v1877_v1 }
  0x2b   : > { %1763 = vmatmul.mubr.msk.bf16.gmra.mrb[8].mxu0 %vm486_vm2, %v454_v44 }
  0x2c   : > { %1766 = vmatprep.mubr.msk.bf16.mxu0 %vm1878_vm0, %v1877_v1 }
  0x33   : > { %1767 = vmatmul.mubr.msk.bf16.gmra.mrb[12].mxu0 %vm486_vm2, %v455_v52 }
  0x34   : > { %1770 = vmatprep.mubr.msk.bf16.mxu0 %vm1878_vm0, %v1877_v1 }
  0x3b   : > { %1771 = vmatmul.mubr.msk.bf16.gmra.mrb[16].mxu0 %vm486_vm2, %v456_v62 }
  0x3c   : > { %1774 = vmatprep.mubr.msk.bf16.mxu0 %vm1878_vm0, %v1877_v1 }
  0x43   : > { %1775 = vmatmul.mubr.msk.bf16.gmra.mrb[20].mxu0 %vm486_vm2, %v457_v7 }
  0x44   : > { %1778 = vmatprep.mubr.msk.bf16.mxu0 %vm1878_vm0, %v1877_v1 }
  0x4b   : > { %1779 = vmatmul.mubr.msk.bf16.gmra.mrb[24].mxu0 %vm486_vm2, %v458_v6 }
  0x4c   : > { %1786 = vmatprep.mubr.msk.bf16.mxu0 %vm1878_vm0, %v1877_v1 }
  0xee   : > { %v546_v10 = vpop.f32.mrb[0].mxu0 }
  0xef   : > { %v1756_v11 = vpop.f32.mrb[1].mxu0  ;;  %v2132_v6 = vadd.f32 %v1645_v30, %v546_v10 }
  0xf0   : > { %v549_v13 = vpop.f32.mrb[2].mxu0 }
  0xf1   : > { %v1757_v14 = vpop.f32.mrb[3].mxu0 }
  0xf6   : > { %v554_v12 = vpop.f32.mrb[4].mxu0 }
  0xf7   : > { %v1760_v15 = vpop.f32.mrb[5].mxu0 }
  0xf8   : > { %v557_v16 = vpop.f32.mrb[6].mxu0 }
  0xf9   : > { %v1761_v17 = vpop.f32.mrb[7].mxu0 }
  0xfe   : > { %v562_v20 = vpop.f32.mrb[8].mxu0 }
  0xff   : > { %v1764_v21 = vpop.f32.mrb[9].mxu0 }
 0x100   : > { %v565_v26 = vpop.f32.mrb[10].mxu0 }
 0x101   : > { %v1765_v29 = vpop.f32.mrb[11].mxu0 }
 0x102   : > { %v2145_v29 = vand.u32 2147483647, %v2132_v6 }
 0x106   : > { %v570_v31 = vpop.f32.mrb[12].mxu0 }
 0x107   : > { %v2102_v32 = vadd.f32 %v1645_v30, %v570_v31  ;;  %v1768_v33 = vpop.f32.mrb[13].mxu0  ;;  %v2147_v31 = vadd.f32 %v1645_v30, %v554_v12  ;;  %v614_v12 = vsel %vm613_vm3, %v2145_v29, -inf }
 0x108   : > { %v573_v34 = vpop.f32.mrb[14].mxu0 }
 0x109   : > { %v2105_v37 = vand.u32 2147483647, %v2102_v32  ;;  %v2107_v38 = vadd.f32 %v1645_v30, %v573_v34  ;;  %v1769_v41 = vpop.f32.mrb[15].mxu0  ;;  %v2151_v34 = vadd.f32 %v1645_v30, %v549_v13 }
 0x10b   : > { %v2110_v44 = vand.u32 2147483647, %v2107_v38  ;;  %v632_v45 = vsel %vm613_vm3, %v2105_v37, -inf  ;;  %v2166_v13 = vand.u32 2147483647, %v2151_v34 }
 0x10c   : > { %633 = vmax.xlane.f32.xlu0 %v632_v45 }
 0x10d   : > { %v635_v51 = vsel %vm613_vm3, %v2110_v44, -inf }
 0x10e   : > { %v578_v46 = vpop.f32.mrb[16].mxu0 }
 0x10f   : > { %v2114_v49 = vadd.f32 %v1645_v30, %v578_v46  ;;  %v1772_v50 = vpop.f32.mrb[17].mxu0 }
 0x110   : > { %636 = vmax.xlane.f32.xlu0 %v635_v51  ;;  %v581_v52 = vpop.f32.mrb[18].mxu0  ;;  %v2156_v50 = vand.u32 2147483647, %v2147_v31  ;;  %v2158_v51 = vadd.f32 %v1645_v30, %v562_v20 }
 0x111   : > { %v2119_v55 = vand.u32 2147483647, %v2114_v49  ;;  %v2121_v56 = vadd.f32 %v1645_v30, %v581_v52  ;;  %v1773_v59 = vpop.f32.mrb[19].mxu0 }
 0x112   : > { %v2173_v20 = vand.u32 2147483647, %v2158_v51 }
 0x113   : > { %v2124_v60 = vand.u32 2147483647, %v2121_v56  ;;  %v638_v61 = vsel %vm613_vm3, %v2119_v55, -inf }
 0x114   : > { %639 = vmax.xlane.f32.xlu1 %v638_v61  ;;  %v2168_v61 = vadd.f32 %v1645_v30, %v557_v16  ;;  %v617_v16 = vsel %vm613_vm3, %v2166_v13, -inf }
 0x115   : > { %v641_v7 = vsel %vm613_vm3, %v2124_v60, -inf }
 0x116   : > { %v586_v62 = vpop.f32.mrb[20].mxu0 }
 0x117   : > { %v2128_v2 = vadd.f32 %v1645_v30, %v586_v62  ;;  %v1776_v5 = vpop.f32.mrb[21].mxu0 }
 0x118   : > { %642 = vmax.xlane.f32.xlu1 %v641_v7  ;;  %v589_v8 = vpop.f32.mrb[22].mxu0  ;;  %v620_v5 = vsel %vm613_vm3, %v2156_v50, -inf  ;;  %v2178_v7 = vand.u32 2147483647, %v2168_v61 }
 0x119   : > { %v2135_v11 = vand.u32 2147483647, %v2128_v2  ;;  %v2137_v14 = vadd.f32 %v1645_v30, %v589_v8  ;;  %v1777_v15 = vpop.f32.mrb[23].mxu0  ;;  %v2180_v8 = vadd.f32 %v1645_v30, %v565_v26 }
 0x11a   : > { %v626_v15 = vsel %vm613_vm3, %v2173_v20, -inf }
 0x11b   : > { %v2140_v17 = vand.u32 2147483647, %v2137_v14  ;;  %v644_v21 = vsel %vm613_vm3, %v2135_v11, -inf }
 0x11c   : > { %645 = vmax.xlane.f32.xlu0 %v644_v21  ;;  %v2187_v21 = vand.u32 2147483647, %v2180_v8 }
 0x11d   : > { %v647_v10 = vsel %vm613_vm3, %v2140_v17, -inf }
 0x11e   : > { %648 = vmax.xlane.f32.xlu1 %v647_v10  ;;  %v594_v33 = vpop.f32.mrb[24].mxu0  ;;  %v623_v10 = vsel %vm613_vm3, %v2178_v7, -inf }
 0x11f   : > { %v2153_v41 = vadd.f32 %v1645_v30, %v594_v33  ;;  %v1780_v45 = vpop.f32.mrb[25].mxu0  ;;  %v629_v33 = vsel %vm613_vm3, %v2187_v21, -inf }
 0x120   : > { %v597_v46 = vpop.f32.mrb[26].mxu0 }
 0x121   : > { %v2161_v52 = vand.u32 2147483647, %v2153_v41  ;;  %v1781_v59 = vpop.f32.mrb[27].mxu0 }
 0x122   : > { %615 = vmax.xlane.f32.xlu1 %v614_v12 }
 0x123   : > { %v650_v62 = vsel %vm613_vm3, %v2161_v52, -inf }
 0x124   : > { %651 = vmax.xlane.f32.xlu0 %v650_v62 }
 0x126   : > { %621 = vmax.xlane.f32.xlu1 %v620_v5 }
 0x128   : > { %618 = vmax.xlane.f32.xlu0 %v617_v16 }
 0x12a   : > { %627 = vmax.xlane.f32.xlu1 %v626_v15 }
 0x12c   : > { %624 = vmax.xlane.f32.xlu0 %v623_v10 }
 0x130   : > { %630 = vmax.xlane.f32.xlu0 %v629_v33 }
 0x199   : > { %v634_v26 = vpop.xlane.xlu0 %633 }
 0x19a   : > { %vm659_vm4 = vcmp.ge.f32.partialorder %v2105_v37, %v634_v26 }
 0x19b   : > { %v2195_v30 = vsel %vm659_vm4, -1.0, %v2105_v37 }
 0x19c   : > { %v697_v45 = vsel %vm613_vm3, %v2195_v30, -inf }
 0x19d   : > { %v637_v46 = vpop.xlane.xlu0 %636  ;;  %698 = vmax.xlane.f32.xlu1 %v697_v45 }
 0x19e   : > { %vm660_vm5 = vcmp.ge.f32.partialorder %v2110_v44, %v637_v46 }
 0x19f   : > { %v2201_v12 = vsel %vm660_vm5, -1.0, %v2110_v44 }
 0x1a0   : > { %v700_v59 = vsel %vm613_vm3, %v2201_v12, -inf }
 0x1a1   : > { %v640_v62 = vpop.xlane.xlu1 %639  ;;  %701 = vmax.xlane.f32.xlu0 %v700_v59 }
 0x1a2   : > { %vm661_vm6 = vcmp.ge.f32.partialorder %v2119_v55, %v640_v62 }
 0x1a3   : > { %v2207_v5 = vsel %vm661_vm6, -1.0, %v2119_v55 }
 0x1a4   : > { %v703_v16 = vsel %vm613_vm3, %v2207_v5, -inf }
 0x1a5   : > { %v643_v15 = vpop.xlane.xlu1 %642  ;;  %704 = vmax.xlane.f32.xlu1 %v703_v16 }
 0x1a6   : > { %vm662_vm7 = vcmp.ge.f32.partialorder %v2124_v60, %v643_v15 }
 0x1a7   : > { %v2213_v10 = vsel %vm662_vm7, -1.0, %v2124_v60 }
 0x1a8   : > { %v706_v33 = vsel %vm613_vm3, %v2213_v10, -inf }
 0x1a9   : > { %v646_v26 = vpop.xlane.xlu0 %645  ;;  %707 = vmax.xlane.f32.xlu0 %v706_v33 }
 0x1aa   : > { %vm663_vm8 = vcmp.ge.f32.partialorder %v2135_v11, %v646_v26 }
 0x1ab   : > { %v649_v45 = vpop.xlane.xlu1 %648  ;;  %v2219_v46 = vsel %vm663_vm8, -1.0, %v2135_v11 }
 0x1ac   : > { %vm664_vm9 = vcmp.ge.f32.partialorder %v2140_v17, %v649_v45  ;;  %v709_v59 = vsel %vm613_vm3, %v2219_v46, -inf }
 0x1ad   : > { %710 = vmax.xlane.f32.xlu1 %v709_v59  ;;  %v2225_v62 = vsel %vm664_vm9, -1.0, %v2140_v17 }
 0x1ae   : > { %v712_v16 = vsel %vm613_vm3, %v2225_v62, -inf }
 0x1af   : > { %v616_v15 = vpop.xlane.xlu1 %615  ;;  %713 = vmax.xlane.f32.xlu0 %v712_v16 }
 0x1b0   : > { %vm653_vm10 = vcmp.ge.f32.partialorder %v2145_v29, %v616_v15 }
 0x1b1   : > { %v2231_v33 = vsel %vm653_vm10, -1.0, %v2145_v29  ;;  %v652_v26 = vpop.xlane.xlu0 %651 }
 0x1b2   : > { %vm665_vm11 = vcmp.ge.f32.partialorder %v2161_v52, %v652_v26  ;;  %v679_v45 = vsel %vm613_vm3, %v2231_v33, -inf }
 0x1b3   : > { %v622_v59 = vpop.xlane.xlu1 %621  ;;  %680 = vmax.xlane.f32.xlu0 %v679_v45  ;;  %v2237_v4 = vsel %vm665_vm11, -1.0, %v2161_v52 }
 0x1b4   : > { %vm655_vm12 = vcmp.ge.f32.partialorder %v2156_v50, %v622_v59  ;;  %v715_v16 = vsel %vm613_vm3, %v2237_v4, -inf }
 0x1b5   : > { %v2243_v15 = vsel %vm655_vm12, -1.0, %v2156_v50  ;;  %716 = vmax.xlane.f32.xlu1 %v715_v16  ;;  %v619_v3 = vpop.xlane.xlu0 %618 }
 0x1b6   : > { %vm654_vm13 = vcmp.ge.f32.partialorder %v2166_v13, %v619_v3  ;;  %v685_v26 = vsel %vm613_vm3, %v2243_v15, -inf }
 0x1b7   : > { %v2249_v45 = vsel %vm654_vm13, -1.0, %v2166_v13  ;;  %v628_v58 = vpop.xlane.xlu1 %627  ;;  %686 = vmax.xlane.f32.xlu0 %v685_v26 }
 0x1b8   : > { %vm657_vm14 = vcmp.ge.f32.partialorder %v2173_v20, %v628_v58  ;;  %v682_v59 = vsel %vm613_vm3, %v2249_v45, -inf }
 0x1b9   : > { %v2255_v57 = vsel %vm657_vm14, -1.0, %v2173_v20  ;;  %683 = vmax.xlane.f32.xlu1 %v682_v59  ;;  %v625_v16 = vpop.xlane.xlu0 %624 }
 0x1ba   : > { %vm656_vm15 = vcmp.ge.f32.partialorder %v2178_v7, %v625_v16  ;;  %v691_v3 = vsel %vm613_vm3, %v2255_v57, -inf }
 0x1bb   : > { %v2261_v48 = vsel %vm656_vm15, -1.0, %v2178_v7  ;;  %692 = vmax.xlane.f32.xlu0 %v691_v3 }
 0x1bc   : > { %v688_v58 = vsel %vm613_vm3, %v2261_v48, -inf }
 0x1bd   : > { %689 = vmax.xlane.f32.xlu1 %v688_v58  ;;  %v631_v26 = vpop.xlane.xlu0 %630 }
 0x1be   : > { %vm658_vm1 = vcmp.ge.f32.partialorder %v2187_v21, %v631_v26 }
 0x1bf   : > { %v2267_v47 = vsel %vm658_vm1, -1.0, %v2187_v21 }
 0x1c0   : > { %v694_v59 = vsel %vm613_vm3, %v2267_v47, -inf }
 0x1c1   : > { %695 = vmax.xlane.f32.xlu1 %v694_v59 }
 0x22a   : > { %v699_v16 = vpop.xlane.xlu1 %698 }
 0x22b   : > { %vm724_vm4 = vcmp.ge.f32.partialorder %v2195_v30, %v699_v16 }
 0x22c   : > { %v2273_v40 = vsel %vm724_vm4, -1.0, %v2195_v30 }
 0x22d   : > { %v762_v3 = vsel %vm613_vm3, %v2273_v40, -inf }
 0x22e   : > { %763 = vmax.xlane.f32.xlu0 %v762_v3  ;;  %v702_v58 = vpop.xlane.xlu0 %701 }
 0x22f   : > { %vm725_vm5 = vcmp.ge.f32.partialorder %v2201_v12, %v702_v58 }
 0x230   : > { %v2279_v26 = vsel %vm725_vm5, -1.0, %v2201_v12 }
 0x231   : > { %v765_v39 = vsel %vm613_vm3, %v2279_v26, -inf }
 0x232   : > { %v705_v59 = vpop.xlane.xlu1 %704  ;;  %766 = vmax.xlane.f32.xlu1 %v765_v39 }
 0x233   : > { %vm726_vm6 = vcmp.ge.f32.partialorder %v2207_v5, %v705_v59 }
 0x234   : > { %v2285_v30 = vsel %vm726_vm6, -1.0, %v2207_v5 }
 0x235   : > { %v768_v16 = vsel %vm613_vm3, %v2285_v30, -inf }
 0x236   : > { %769 = vmax.xlane.f32.xlu0 %v768_v16  ;;  %v708_v3 = vpop.xlane.xlu0 %707 }
 0x237   : > { %vm727_vm7 = vcmp.ge.f32.partialorder %v2213_v10, %v708_v3 }
 0x238   : > { %v2291_v12 = vsel %vm727_vm7, -1.0, %v2213_v10 }
 0x239   : > { %v771_v58 = vsel %vm613_vm3, %v2291_v12, -inf }
 0x23a   : > { %v711_v28 = vpop.xlane.xlu1 %710  ;;  %772 = vmax.xlane.f32.xlu1 %v771_v58 }
 0x23b   : > { %vm728_vm8 = vcmp.ge.f32.partialorder %v2219_v46, %v711_v28 }
 0x23c   : > { %v2297_v39 = vsel %vm728_vm8, -1.0, %v2219_v46  ;;  %v714_v5 = vpop.xlane.xlu0 %713 }
 0x23d   : > { %vm729_vm9 = vcmp.ge.f32.partialorder %v2225_v62, %v714_v5  ;;  %v774_v59 = vsel %vm613_vm3, %v2297_v39, -inf }
 0x23e   : > { %v2303_v16 = vsel %vm729_vm9, -1.0, %v2225_v62  ;;  %775 = vmax.xlane.f32.xlu0 %v774_v59 }
 0x23f   : > { %v777_v10 = vsel %vm613_vm3, %v2303_v16, -inf }
 0x240   : > { %778 = vmax.xlane.f32.xlu1 %v777_v10  ;;  %v681_v3 = vpop.xlane.xlu0 %680 }
 0x241   : > { %vm718_vm10 = vcmp.ge.f32.partialorder %v2231_v33, %v681_v3 }
 0x242   : > { %v2309_v28 = vsel %vm718_vm10, -1.0, %v2231_v33  ;;  %v717_v46 = vpop.xlane.xlu1 %716 }
 0x243   : > { %vm730_vm11 = vcmp.ge.f32.partialorder %v2237_v4, %v717_v46  ;;  %v744_v58 = vsel %vm613_vm3, %v2309_v28, -inf }
 0x244   : > { %v2315_v62 = vsel %vm730_vm11, -1.0, %v2237_v4  ;;  %745 = vmax.xlane.f32.xlu1 %v744_v58  ;;  %v687_v5 = vpop.xlane.xlu0 %686 }
 0x245   : > { %vm720_vm12 = vcmp.ge.f32.partialorder %v2243_v15, %v687_v5  ;;  %v780_v59 = vsel %vm613_vm3, %v2315_v62, -inf }
 0x246   : > { %v2321_v10 = vsel %vm720_vm12, -1.0, %v2243_v15  ;;  %781 = vmax.xlane.f32.xlu0 %v780_v59  ;;  %v684_v33 = vpop.xlane.xlu1 %683 }
 0x247   : > { %vm719_vm13 = vcmp.ge.f32.partialorder %v2249_v45, %v684_v33  ;;  %v750_v3 = vsel %vm613_vm3, %v2321_v10, -inf }
 0x248   : > { %v2327_v4 = vsel %vm719_vm13, -1.0, %v2249_v45  ;;  %751 = vmax.xlane.f32.xlu1 %v750_v3  ;;  %v693_v46 = vpop.xlane.xlu0 %692 }
 0x249   : > { %vm722_vm14 = vcmp.ge.f32.partialorder %v2255_v57, %v693_v46  ;;  %v747_v58 = vsel %vm613_vm3, %v2327_v4, -inf }
 0x24a   : > { %v2333_v15 = vsel %vm722_vm14, -1.0, %v2255_v57  ;;  %748 = vmax.xlane.f32.xlu0 %v747_v58  ;;  %v690_v5 = vpop.xlane.xlu1 %689 }
 0x24b   : > { %vm721_vm15 = vcmp.ge.f32.partialorder %v2261_v48, %v690_v5  ;;  %v756_v59 = vsel %vm613_vm3, %v2333_v15, -inf }
 0x24c   : > { %v2339_v45 = vsel %vm721_vm15, -1.0, %v2261_v48  ;;  %757 = vmax.xlane.f32.xlu1 %v756_v59 }
 0x24d   : > { %v753_v33 = vsel %vm613_vm3, %v2339_v45, -inf }
 0x24e   : > { %754 = vmax.xlane.f32.xlu0 %v753_v33  ;;  %v696_v3 = vpop.xlane.xlu1 %695 }
 0x24f   : > { %vm723_vm1 = vcmp.ge.f32.partialorder %v2267_v47, %v696_v3 }
 0x250   : > { %v2345_v57 = vsel %vm723_vm1, -1.0, %v2267_v47 }
 0x251   : > { %v759_v46 = vsel %vm613_vm3, %v2345_v57, -inf }
 0x252   : > { %760 = vmax.xlane.f32.xlu0 %v759_v46 }
 0x2bb   : > { %v764_v58 = vpop.xlane.xlu0 %763 }
 0x2bc   : > { %vm789_vm4 = vcmp.ge.f32.partialorder %v2273_v40, %v764_v58 }
 0x2bd   : > { %v2351_v48 = vsel %vm789_vm4, -1.0, %v2273_v40 }
 0x2be   : > { %v827_v5 = vsel %vm613_vm3, %v2351_v48, -inf }
 0x2bf   : > { %v767_v59 = vpop.xlane.xlu1 %766  ;;  %828 = vmax.xlane.f32.xlu1 %v827_v5 }
 0x2c0   : > { %vm790_vm5 = vcmp.ge.f32.partialorder %v2279_v26, %v767_v59 }
 0x2c1   : > { %v2357_v47 = vsel %vm790_vm5, -1.0, %v2279_v26 }
 0x2c2   : > { %v830_v33 = vsel %vm613_vm3, %v2357_v47, -inf }
 0x2c3   : > { %831 = vmax.xlane.f32.xlu0 %v830_v33  ;;  %v770_v3 = vpop.xlane.xlu0 %769 }
 0x2c4   : > { %vm791_vm6 = vcmp.ge.f32.partialorder %v2285_v30, %v770_v3 }
 0x2c5   : > { %v2363_v40 = vsel %vm791_vm6, -1.0, %v2285_v30 }
 0x2c6   : > { %v833_v46 = vsel %vm613_vm3, %v2363_v40, -inf }
 0x2c7   : > { %v773_v58 = vpop.xlane.xlu1 %772  ;;  %834 = vmax.xlane.f32.xlu1 %v833_v46 }
 0x2c8   : > { %vm792_vm7 = vcmp.ge.f32.partialorder %v2291_v12, %v773_v58 }
 0x2c9   : > { %v2369_v26 = vsel %vm792_vm7, -1.0, %v2291_v12 }
 0x2ca   : > { %v836_v5 = vsel %vm613_vm3, %v2369_v26, -inf }
 0x2cb   : > { %837 = vmax.xlane.f32.xlu0 %v836_v5  ;;  %v776_v59 = vpop.xlane.xlu0 %775 }
 0x2cc   : > { %vm793_vm8 = vcmp.ge.f32.partialorder %v2297_v39, %v776_v59 }
 0x2cd   : > { %v2375_v30 = vsel %vm793_vm8, -1.0, %v2297_v39  ;;  %v779_v33 = vpop.xlane.xlu1 %778 }
 0x2ce   : > { %vm794_vm9 = vcmp.ge.f32.partialorder %v2303_v16, %v779_v33  ;;  %v839_v3 = vsel %vm613_vm3, %v2375_v30, -inf }
 0x2cf   : > { %v2381_v46 = vsel %vm794_vm9, -1.0, %v2303_v16  ;;  %840 = vmax.xlane.f32.xlu1 %v839_v3 }
 0x2d0   : > { %v842_v12 = vsel %vm613_vm3, %v2381_v46, -inf }
 0x2d1   : > { %843 = vmax.xlane.f32.xlu0 %v842_v12  ;;  %v746_v58 = vpop.xlane.xlu1 %745 }
 0x2d2   : > { %vm783_vm10 = vcmp.ge.f32.partialorder %v2309_v28, %v746_v58 }
 0x2d3   : > { %v2387_v39 = vsel %vm783_vm10, -1.0, %v2309_v28  ;;  %v782_v5 = vpop.xlane.xlu0 %781 }
 0x2d4   : > { %vm795_vm11 = vcmp.ge.f32.partialorder %v2315_v62, %v782_v5  ;;  %v809_v59 = vsel %vm613_vm3, %v2387_v39, -inf }
 0x2d5   : > { %v2393_v16 = vsel %vm795_vm11, -1.0, %v2315_v62  ;;  %810 = vmax.xlane.f32.xlu0 %v809_v59  ;;  %v752_v33 = vpop.xlane.xlu1 %751 }
 0x2d6   : > { %vm785_vm12 = vcmp.ge.f32.partialorder %v2321_v10, %v752_v33  ;;  %v845_v3 = vsel %vm613_vm3, %v2393_v16, -inf }
 0x2d7   : > { %v2399_v12 = vsel %vm785_vm12, -1.0, %v2321_v10  ;;  %846 = vmax.xlane.f32.xlu1 %v845_v3  ;;  %v749_v28 = vpop.xlane.xlu0 %748 }
 0x2d8   : > { %vm784_vm13 = vcmp.ge.f32.partialorder %v2327_v4, %v749_v28  ;;  %v815_v58 = vsel %vm613_vm3, %v2399_v12, -inf }
 0x2d9   : > { %v2405_v62 = vsel %vm784_vm13, -1.0, %v2327_v4  ;;  %816 = vmax.xlane.f32.xlu0 %v815_v58  ;;  %v758_v5 = vpop.xlane.xlu1 %757 }
 0x2da   : > { %vm787_vm14 = vcmp.ge.f32.partialorder %v2333_v15, %v758_v5  ;;  %v812_v59 = vsel %vm613_vm3, %v2405_v62, -inf }
 0x2db   : > { %v2411_v10 = vsel %vm787_vm14, -1.0, %v2333_v15  ;;  %813 = vmax.xlane.f32.xlu1 %v812_v59  ;;  %v755_v33 = vpop.xlane.xlu0 %754 }
 0x2dc   : > { %vm786_vm15 = vcmp.ge.f32.partialorder %v2339_v45, %v755_v33  ;;  %v821_v3 = vsel %vm613_vm3, %v2411_v10, -inf }
 0x2dd   : > { %v2417_v4 = vsel %vm786_vm15, -1.0, %v2339_v45  ;;  %822 = vmax.xlane.f32.xlu0 %v821_v3 }
 0x2de   : > { %v818_v28 = vsel %vm613_vm3, %v2417_v4, -inf }
 0x2df   : > { %819 = vmax.xlane.f32.xlu1 %v818_v28  ;;  %v761_v58 = vpop.xlane.xlu0 %760 }
 0x2e0   : > { %vm788_vm1 = vcmp.ge.f32.partialorder %v2345_v57, %v761_v58 }
 0x2e1   : > { %v2423_v15 = vsel %vm788_vm1, -1.0, %v2345_v57 }
 0x2e2   : > { %v824_v5 = vsel %vm613_vm3, %v2423_v15, -inf }
 0x2e3   : > { %825 = vmax.xlane.f32.xlu1 %v824_v5 }
 0x34c   : > { %v829_v59 = vpop.xlane.xlu1 %828 }
 0x34d   : > { %vm854_vm4 = vcmp.ge.f32.partialorder %v2351_v48, %v829_v59 }
 0x34e   : > { %v2429_v45 = vsel %vm854_vm4, -1.0, %v2351_v48 }
 0x34f   : > { %v892_v33 = vsel %vm613_vm3, %v2429_v45, -inf }
 0x350   : > { %893 = vmax.xlane.f32.xlu0 %v892_v33  ;;  %v832_v3 = vpop.xlane.xlu0 %831 }
 0x351   : > { %vm855_vm5 = vcmp.ge.f32.partialorder %v2357_v47, %v832_v3 }
 0x352   : > { %v2435_v57 = vsel %vm855_vm5, -1.0, %v2357_v47 }
 0x353   : > { %v895_v28 = vsel %vm613_vm3, %v2435_v57, -inf }
 0x354   : > { %v835_v58 = vpop.xlane.xlu1 %834  ;;  %896 = vmax.xlane.f32.xlu1 %v895_v28 }
 0x355   : > { %vm856_vm6 = vcmp.ge.f32.partialorder %v2363_v40, %v835_v58 }
 0x356   : > { %v2441_v48 = vsel %vm856_vm6, -1.0, %v2363_v40 }
 0x357   : > { %v898_v5 = vsel %vm613_vm3, %v2441_v48, -inf }
 0x358   : > { %899 = vmax.xlane.f32.xlu0 %v898_v5  ;;  %v838_v59 = vpop.xlane.xlu0 %837 }
 0x359   : > { %vm857_vm7 = vcmp.ge.f32.partialorder %v2369_v26, %v838_v59 }
 0x35a   : > { %v2447_v47 = vsel %vm857_vm7, -1.0, %v2369_v26 }
 0x35b   : > { %v901_v33 = vsel %vm613_vm3, %v2447_v47, -inf }
 0x35c   : > { %v841_v3 = vpop.xlane.xlu1 %840  ;;  %902 = vmax.xlane.f32.xlu1 %v901_v33 }
 0x35d   : > { %vm858_vm8 = vcmp.ge.f32.partialorder %v2375_v30, %v841_v3 }
 0x35e   : > { %v2453_v40 = vsel %vm858_vm8, -1.0, %v2375_v30  ;;  %v844_v28 = vpop.xlane.xlu0 %843 }
 0x35f   : > { %vm859_vm9 = vcmp.ge.f32.partialorder %v2381_v46, %v844_v28  ;;  %v904_v58 = vsel %vm613_vm3, %v2453_v40, -inf }
 0x360   : > { %v2459_v5 = vsel %vm859_vm9, -1.0, %v2381_v46  ;;  %905 = vmax.xlane.f32.xlu0 %v904_v58 }
 0x361   : > { %v907_v26 = vsel %vm613_vm3, %v2459_v5, -inf }
 0x362   : > { %908 = vmax.xlane.f32.xlu1 %v907_v26  ;;  %v811_v59 = vpop.xlane.xlu0 %810 }
 0x363   : > { %vm848_vm10 = vcmp.ge.f32.partialorder %v2387_v39, %v811_v59 }
 0x364   : > { %v2465_v30 = vsel %vm848_vm10, -1.0, %v2387_v39  ;;  %v847_v33 = vpop.xlane.xlu1 %846 }
 0x365   : > { %vm860_vm11 = vcmp.ge.f32.partialorder %v2393_v16, %v847_v33  ;;  %v874_v3 = vsel %vm613_vm3, %v2465_v30, -inf }
 0x366   : > { %v2471_v46 = vsel %vm860_vm11, -1.0, %v2393_v16  ;;  %875 = vmax.xlane.f32.xlu1 %v874_v3  ;;  %v817_v28 = vpop.xlane.xlu0 %816 }
 0x367   : > { %vm850_vm12 = vcmp.ge.f32.partialorder %v2399_v12, %v817_v28  ;;  %v910_v58 = vsel %vm613_vm3, %v2471_v46, -inf }
 0x368   : > { %v2477_v26 = vsel %vm850_vm12, -1.0, %v2399_v12  ;;  %911 = vmax.xlane.f32.xlu0 %v910_v58  ;;  %v814_v39 = vpop.xlane.xlu1 %813 }
 0x369   : > { %vm849_vm13 = vcmp.ge.f32.partialorder %v2405_v62, %v814_v39  ;;  %v880_v59 = vsel %vm613_vm3, %v2477_v26, -inf }
 0x36a   : > { %v2483_v16 = vsel %vm849_vm13, -1.0, %v2405_v62  ;;  %881 = vmax.xlane.f32.xlu1 %v880_v59  ;;  %v823_v33 = vpop.xlane.xlu0 %822 }
 0x36b   : > { %vm852_vm14 = vcmp.ge.f32.partialorder %v2411_v10, %v823_v33  ;;  %v877_v3 = vsel %vm613_vm3, %v2483_v16, -inf }
 0x36c   : > { %v2489_v12 = vsel %vm852_vm14, -1.0, %v2411_v10  ;;  %878 = vmax.xlane.f32.xlu0 %v877_v3  ;;  %v820_v28 = vpop.xlane.xlu1 %819 }
 0x36d   : > { %vm851_vm15 = vcmp.ge.f32.partialorder %v2417_v4, %v820_v28  ;;  %v886_v58 = vsel %vm613_vm3, %v2489_v12, -inf }
 0x36e   : > { %v2495_v62 = vsel %vm851_vm15, -1.0, %v2417_v4  ;;  %887 = vmax.xlane.f32.xlu1 %v886_v58 }
 0x36f   : > { %v883_v39 = vsel %vm613_vm3, %v2495_v62, -inf }
 0x370   : > { %884 = vmax.xlane.f32.xlu0 %v883_v39  ;;  %v826_v59 = vpop.xlane.xlu1 %825 }
 0x371   : > { %vm853_vm1 = vcmp.ge.f32.partialorder %v2423_v15, %v826_v59 }
 0x372   : > { %v2501_v10 = vsel %vm853_vm1, -1.0, %v2423_v15 }
 0x373   : > { %v889_v33 = vsel %vm613_vm3, %v2501_v10, -inf }
 0x374   : > { %890 = vmax.xlane.f32.xlu0 %v889_v33 }
 0x3dd   : > { %v894_v3 = vpop.xlane.xlu0 %893 }
 0x3de   : > { %vm919_vm4 = vcmp.ge.f32.partialorder %v2429_v45, %v894_v3 }
 0x3df   : > { %v2507_v4 = vsel %vm919_vm4, -1.0, %v2429_v45 }
 0x3e0   : > { %v957_v28 = vsel %vm613_vm3, %v2507_v4, -inf }
 0x3e1   : > { %v897_v58 = vpop.xlane.xlu1 %896  ;;  %958 = vmax.xlane.f32.xlu1 %v957_v28 }
 0x3e2   : > { %vm920_vm5 = vcmp.ge.f32.partialorder %v2435_v57, %v897_v58 }
 0x3e3   : > { %v2513_v15 = vsel %vm920_vm5, -1.0, %v2435_v57 }
 0x3e4   : > { %v960_v39 = vsel %vm613_vm3, %v2513_v15, -inf }
 0x3e5   : > { %961 = vmax.xlane.f32.xlu0 %v960_v39  ;;  %v900_v59 = vpop.xlane.xlu0 %899 }
 0x3e6   : > { %vm921_vm6 = vcmp.ge.f32.partialorder %v2441_v48, %v900_v59 }
 0x3e7   : > { %v2519_v45 = vsel %vm921_vm6, -1.0, %v2441_v48 }
 0x3e8   : > { %v963_v33 = vsel %vm613_vm3, %v2519_v45, -inf }
 0x3e9   : > { %v903_v3 = vpop.xlane.xlu1 %902  ;;  %964 = vmax.xlane.f32.xlu1 %v963_v33 }
 0x3ea   : > { %vm922_vm7 = vcmp.ge.f32.partialorder %v2447_v47, %v903_v3 }
 0x3eb   : > { %v2525_v57 = vsel %vm922_vm7, -1.0, %v2447_v47 }
 0x3ec   : > { %v966_v28 = vsel %vm613_vm3, %v2525_v57, -inf }
 0x3ed   : > { %967 = vmax.xlane.f32.xlu0 %v966_v28  ;;  %v906_v58 = vpop.xlane.xlu0 %905 }
 0x3ee   : > { %vm923_vm8 = vcmp.ge.f32.partialorder %v2453_v40, %v906_v58 }
 0x3ef   : > { %v2531_v48 = vsel %vm923_vm8, -1.0, %v2453_v40  ;;  %v909_v39 = vpop.xlane.xlu1 %908 }
 0x3f0   : > { %vm924_vm9 = vcmp.ge.f32.partialorder %v2459_v5, %v909_v39  ;;  %v969_v59 = vsel %vm613_vm3, %v2531_v48, -inf }
 0x3f1   : > { %v2537_v33 = vsel %vm924_vm9, -1.0, %v2459_v5  ;;  %970 = vmax.xlane.f32.xlu1 %v969_v59 }
 0x3f2   : > { %v972_v47 = vsel %vm613_vm3, %v2537_v33, -inf }
 0x3f3   : > { %973 = vmax.xlane.f32.xlu0 %v972_v47  ;;  %v876_v3 = vpop.xlane.xlu1 %875 }
 0x3f4   : > { %vm913_vm10 = vcmp.ge.f32.partialorder %v2465_v30, %v876_v3 }
 0x3f5   : > { %v2543_v40 = vsel %vm913_vm10, -1.0, %v2465_v30  ;;  %v912_v28 = vpop.xlane.xlu0 %911 }
 0x3f6   : > { %vm925_vm11 = vcmp.ge.f32.partialorder %v2471_v46, %v912_v28  ;;  %v939_v58 = vsel %vm613_vm3, %v2543_v40, -inf }
 0x3f7   : > { %v2549_v5 = vsel %vm925_vm11, -1.0, %v2471_v46  ;;  %940 = vmax.xlane.f32.xlu0 %v939_v58  ;;  %v882_v39 = vpop.xlane.xlu1 %881 }
 0x3f8   : > { %vm915_vm12 = vcmp.ge.f32.partialorder %v2477_v26, %v882_v39  ;;  %v975_v59 = vsel %vm613_vm3, %v2549_v5, -inf }
 0x3f9   : > { %v2555_v47 = vsel %vm915_vm12, -1.0, %v2477_v26  ;;  %976 = vmax.xlane.f32.xlu1 %v975_v59  ;;  %v879_v30 = vpop.xlane.xlu0 %878 }
 0x3fa   : > { %vm914_vm13 = vcmp.ge.f32.partialorder %v2483_v16, %v879_v30  ;;  %v945_v3 = vsel %vm613_vm3, %v2555_v47, -inf }
 0x3fb   : > { %v2561_v46 = vsel %vm914_vm13, -1.0, %v2483_v16  ;;  %946 = vmax.xlane.f32.xlu0 %v945_v3  ;;  %v888_v28 = vpop.xlane.xlu1 %887 }
 0x3fc   : > { %vm917_vm14 = vcmp.ge.f32.partialorder %v2489_v12, %v888_v28  ;;  %v942_v58 = vsel %vm613_vm3, %v2561_v46, -inf }
 0x3fd   : > { %v2567_v26 = vsel %vm917_vm14, -1.0, %v2489_v12  ;;  %943 = vmax.xlane.f32.xlu1 %v942_v58  ;;  %v885_v39 = vpop.xlane.xlu0 %884 }
 0x3fe   : > { %vm916_vm15 = vcmp.ge.f32.partialorder %v2495_v62, %v885_v39  ;;  %v951_v59 = vsel %vm613_vm3, %v2567_v26, -inf }
 0x3ff   : > { %v2573_v16 = vsel %vm916_vm15, -1.0, %v2495_v62  ;;  %952 = vmax.xlane.f32.xlu0 %v951_v59 }
 0x400   : > { %v948_v30 = vsel %vm613_vm3, %v2573_v16, -inf }
 0x401   : > { %949 = vmax.xlane.f32.xlu1 %v948_v30  ;;  %v891_v3 = vpop.xlane.xlu0 %890 }
 0x402   : > { %vm918_vm1 = vcmp.ge.f32.partialorder %v2501_v10, %v891_v3 }
 0x403   : > { %v2579_v12 = vsel %vm918_vm1, -1.0, %v2501_v10 }
 0x404   : > { %v954_v28 = vsel %vm613_vm3, %v2579_v12, -inf }
 0x405   : > { %955 = vmax.xlane.f32.xlu1 %v954_v28 }
 0x46e   : > { %v959_v58 = vpop.xlane.xlu1 %958 }
 0x46f   : > { %vm984_vm4 = vcmp.ge.f32.partialorder %v2507_v4, %v959_v58 }
 0x470   : > { %v2585_v62 = vsel %vm984_vm4, -1.0, %v2507_v4 }
 0x471   : > { %v1022_v39 = vsel %vm613_vm3, %v2585_v62, -inf }
 0x472   : > { %1023 = vmax.xlane.f32.xlu0 %v1022_v39  ;;  %v962_v59 = vpop.xlane.xlu0 %961 }
 0x473   : > { %vm985_vm5 = vcmp.ge.f32.partialorder %v2513_v15, %v962_v59 }
 0x474   : > { %v2591_v10 = vsel %vm985_vm5, -1.0, %v2513_v15 }
 0x475   : > { %v1025_v30 = vsel %vm613_vm3, %v2591_v10, -inf }
 0x476   : > { %v965_v3 = vpop.xlane.xlu1 %964  ;;  %1026 = vmax.xlane.f32.xlu1 %v1025_v30 }
 0x477   : > { %vm986_vm6 = vcmp.ge.f32.partialorder %v2519_v45, %v965_v3 }
 0x478   : > { %v2597_v4 = vsel %vm986_vm6, -1.0, %v2519_v45 }
 0x479   : > { %v1028_v28 = vsel %vm613_vm3, %v2597_v4, -inf }
 0x47a   : > { %1029 = vmax.xlane.f32.xlu0 %v1028_v28  ;;  %v968_v58 = vpop.xlane.xlu0 %967 }
 0x47b   : > { %vm987_vm7 = vcmp.ge.f32.partialorder %v2525_v57, %v968_v58 }
 0x47c   : > { %v2603_v15 = vsel %vm987_vm7, -1.0, %v2525_v57 }
 0x47d   : > { %v1031_v39 = vsel %vm613_vm3, %v2603_v15, -inf }
 0x47e   : > { %v971_v59 = vpop.xlane.xlu1 %970  ;;  %1032 = vmax.xlane.f32.xlu1 %v1031_v39 }
 0x47f   : > { %vm988_vm8 = vcmp.ge.f32.partialorder %v2531_v48, %v971_v59 }
 0x480   : > { %v2609_v45 = vsel %vm988_vm8, -1.0, %v2531_v48  ;;  %v974_v30 = vpop.xlane.xlu0 %973 }
 0x481   : > { %vm989_vm9 = vcmp.ge.f32.partialorder %v2537_v33, %v974_v30  ;;  %v1034_v3 = vsel %vm613_vm3, %v2609_v45, -inf }
 0x482   : > { %v2615_v28 = vsel %vm989_vm9, -1.0, %v2537_v33  ;;  %1035 = vmax.xlane.f32.xlu0 %v1034_v3 }
 0x483   : > { %v1037_v57 = vsel %vm613_vm3, %v2615_v28, -inf }
 0x484   : > { %1038 = vmax.xlane.f32.xlu1 %v1037_v57  ;;  %v941_v58 = vpop.xlane.xlu0 %940 }
 0x485   : > { %vm978_vm10 = vcmp.ge.f32.partialorder %v2543_v40, %v941_v58 }
 0x486   : > { %v2621_v48 = vsel %vm978_vm10, -1.0, %v2543_v40  ;;  %v977_v39 = vpop.xlane.xlu1 %976 }
 0x487   : > { %vm990_vm11 = vcmp.ge.f32.partialorder %v2549_v5, %v977_v39  ;;  %v1004_v59 = vsel %vm613_vm3, %v2621_v48, -inf }
 0x488   : > { %v2627_v33 = vsel %vm990_vm11, -1.0, %v2549_v5  ;;  %1005 = vmax.xlane.f32.xlu1 %v1004_v59  ;;  %v947_v30 = vpop.xlane.xlu0 %946 }
 0x489   : > { %vm980_vm12 = vcmp.ge.f32.partialorder %v2555_v47, %v947_v30  ;;  %v1040_v3 = vsel %vm613_vm3, %v2627_v33, -inf }
 0x48a   : > { %v2633_v57 = vsel %vm980_vm12, -1.0, %v2555_v47  ;;  %1041 = vmax.xlane.f32.xlu0 %v1040_v3  ;;  %v944_v40 = vpop.xlane.xlu1 %943 }
 0x48b   : > { %vm979_vm13 = vcmp.ge.f32.partialorder %v2561_v46, %v944_v40  ;;  %v1010_v58 = vsel %vm613_vm3, %v2633_v57, -inf }
 0x48c   : > { %v2639_v5 = vsel %vm979_vm13, -1.0, %v2561_v46  ;;  %1011 = vmax.xlane.f32.xlu1 %v1010_v58  ;;  %v953_v39 = vpop.xlane.xlu0 %952 }
 0x48d   : > { %vm982_vm14 = vcmp.ge.f32.partialorder %v2567_v26, %v953_v39  ;;  %v1007_v59 = vsel %vm613_vm3, %v2639_v5, -inf }
 0x48e   : > { %v2645_v47 = vsel %vm982_vm14, -1.0, %v2567_v26  ;;  %1008 = vmax.xlane.f32.xlu0 %v1007_v59  ;;  %v950_v30 = vpop.xlane.xlu1 %949 }
 0x48f   : > { %vm981_vm15 = vcmp.ge.f32.partialorder %v2573_v16, %v950_v30  ;;  %v1016_v3 = vsel %vm613_vm3, %v2645_v47, -inf }
 0x490   : > { %v2651_v46 = vsel %vm981_vm15, -1.0, %v2573_v16  ;;  %1017 = vmax.xlane.f32.xlu1 %v1016_v3 }
 0x491   : > { %v1013_v40 = vsel %vm613_vm3, %v2651_v46, -inf }
 0x492   : > { %1014 = vmax.xlane.f32.xlu0 %v1013_v40  ;;  %v956_v58 = vpop.xlane.xlu1 %955 }
 0x493   : > { %vm983_vm1 = vcmp.ge.f32.partialorder %v2579_v12, %v956_v58 }
 0x494   : > { %v2657_v26 = vsel %vm983_vm1, -1.0, %v2579_v12 }
 0x495   : > { %v1019_v39 = vsel %vm613_vm3, %v2657_v26, -inf }
 0x496   : > { %1020 = vmax.xlane.f32.xlu0 %v1019_v39 }
 0x4ff   : > { %v1024_v59 = vpop.xlane.xlu0 %1023 }
 0x500   : > { %vm1049_vm4 = vcmp.ge.f32.partialorder %v2585_v62, %v1024_v59 }
 0x501   : > { %v1062_v16 = vsel %vm1049_vm4, -1.0, %v2585_v62 }
 0x502   : > { %v1087_v30 = vsel %vm613_vm3, %v1062_v16, -inf }
 0x503   : > { %v1027_v3 = vpop.xlane.xlu1 %1026  ;;  %1088 = vmax.xlane.f32.xlu1 %v1087_v30  ;;  %v1865_v30 = vld [vmem:[%s2950_s7] sm:$0xff]  }
 0x504   : > { %vm1050_vm5 = vcmp.ge.f32.partialorder %v2591_v10, %v1027_v3  ;;  %1848 = vmatpush3.bf16.msra.mxu1 %v1865_v30  ;;  %1783 = vmatpush3.bf16.msra.mxu0 %v1865_v30 }
 0x505   : > { %v1063_v40 = vsel %vm1050_vm5, -1.0, %v2591_v10  ;;  %1847 = vmatprep.subr.bf16.mxu1 %v1877_v1  ;;  %1784 = vmatprep.subr.bf16.mxu0 %v1877_v1 }
 0x506   : > { %v1090_v12 = vsel %vm613_vm3, %v1063_v40, -inf }
 0x507   : > { %1091 = vmax.xlane.f32.xlu0 %v1090_v12  ;;  %v1030_v58 = vpop.xlane.xlu0 %1029  ;;  %v1866_v12 = vld [vmem:[%s2950_s7 + $0x8] sm:$0xff]  }
 0x508   : > { %vm1051_vm6 = vcmp.ge.f32.partialorder %v2597_v4, %v1030_v58  ;;  %1849 = vmatpush3.bf16.msra.mxu1 %v1866_v12  ;;  %1785 = vmatpush3.bf16.msra.mxu0 %v1866_v12 }
 0x509   : > { %v1064_v39 = vsel %vm1051_vm6, -1.0, %v2597_v4  ;;  %1814 = vmatprep.subr.bf16.mxu1 %v1877_v1 }
 0x50a   : > { %v1093_v59 = vsel %vm613_vm3, %v1064_v39, -inf }
 0x50b   : > { %v1033_v27 = vpop.xlane.xlu1 %1032  ;;  %1094 = vmax.xlane.f32.xlu1 %v1093_v59 }
 0x50c   : > { %vm1052_vm7 = vcmp.ge.f32.partialorder %v2603_v15, %v1033_v27 }
 0x50d   : > { %v1065_v62 = vsel %vm1052_vm7, -1.0, %v2603_v15 }
 0x50e   : > { %v1096_v16 = vsel %vm613_vm3, %v1065_v62, -inf }
 0x50f   : > { %1097 = vmax.xlane.f32.xlu0 %v1096_v16  ;;  %v1036_v10 = vpop.xlane.xlu0 %1035 }
 0x510   : > { %vm1053_vm8 = vcmp.ge.f32.partialorder %v2609_v45, %v1036_v10 }
 0x511   : > { %v1039_v3 = vpop.xlane.xlu1 %1038  ;;  %v1066_v4 = vsel %vm1053_vm8, -1.0, %v2609_v45 }
 0x512   : > { %vm1054_vm9 = vcmp.ge.f32.partialorder %v2615_v28, %v1039_v3  ;;  %v1099_v40 = vsel %vm613_vm3, %v1066_v4, -inf }
 0x513   : > { %1100 = vmax.xlane.f32.xlu1 %v1099_v40  ;;  %v1067_v27 = vsel %vm1054_vm9, -1.0, %v2615_v28 }
 0x514   : > { %v1102_v15 = vsel %vm613_vm3, %v1067_v27, -inf }
 0x515   : > { %1103 = vmax.xlane.f32.xlu0 %v1102_v15  ;;  %v1006_v45 = vpop.xlane.xlu1 %1005 }
 0x516   : > { %vm1043_vm10 = vcmp.ge.f32.partialorder %v2621_v48, %v1006_v45 }
 0x517   : > { %v1056_v58 = vsel %vm1043_vm10, -1.0, %v2621_v48  ;;  %v1042_v39 = vpop.xlane.xlu0 %1041 }
 0x518   : > { %vm1055_vm11 = vcmp.ge.f32.partialorder %v2627_v33, %v1042_v39  ;;  %v1069_v28 = vsel %vm613_vm3, %v1056_v58, -inf }
 0x519   : > { %1070 = vmax.xlane.f32.xlu0 %v1069_v28  ;;  %v1012_v59 = vpop.xlane.xlu1 %1011  ;;  %v1068_v62 = vsel %vm1055_vm11, -1.0, %v2627_v33 }
 0x51a   : > { %vm1045_vm12 = vcmp.ge.f32.partialorder %v2633_v57, %v1012_v59  ;;  %v1105_v16 = vsel %vm613_vm3, %v1068_v62, -inf  ;;  %v1867_v59 = vld [vmem:[%s2948_s5] sm:$0xff]  }
 0x51b   : > { %v1058_v10 = vsel %vm1045_vm12, -1.0, %v2633_v57  ;;  %1106 = vmax.xlane.f32.xlu1 %v1105_v16  ;;  %v1009_v30 = vpop.xlane.xlu0 %1008 }
 0x51c   : > { %vm1044_vm13 = vcmp.ge.f32.partialorder %v2639_v5, %v1009_v30  ;;  %v1075_v48 = vsel %vm613_vm3, %v1058_v10, -inf }
 0x51d   : > { %v1057_v3 = vsel %vm1044_vm13, -1.0, %v2639_v5  ;;  %1076 = vmax.xlane.f32.xlu0 %v1075_v48  ;;  %v1018_v4 = vpop.xlane.xlu1 %1017 }
 0x51e   : > { %vm1047_vm14 = vcmp.ge.f32.partialorder %v2645_v47, %v1018_v4  ;;  %v1072_v33 = vsel %vm613_vm3, %v1057_v3, -inf }
 0x51f   : > { %v1060_v40 = vsel %vm1047_vm14, -1.0, %v2645_v47  ;;  %1073 = vmax.xlane.f32.xlu1 %v1072_v33  ;;  %v1015_v27 = vpop.xlane.xlu0 %1014 }
 0x520   : > { %vm1046_vm15 = vcmp.ge.f32.partialorder %v2651_v46, %v1015_v27  ;;  %v1081_v57 = vsel %vm613_vm3, %v1060_v40, -inf }
 0x521   : > { %v1059_v15 = vsel %vm1046_vm15, -1.0, %v2651_v46  ;;  %1082 = vmax.xlane.f32.xlu0 %v1081_v57 }
 0x522   : > { %v1078_v12 = vsel %vm613_vm3, %v1059_v15, -inf }
 0x523   : > { %1079 = vmax.xlane.f32.xlu1 %v1078_v12  ;;  %v1021_v5 = vpop.xlane.xlu0 %1020 }
 0x524   : > { %vm1048_vm1 = vcmp.ge.f32.partialorder %v2657_v26, %v1021_v5 }
 0x525   : > { %v1061_v45 = vsel %vm1048_vm1, -1.0, %v2657_v26 }
 0x526   : > { %v1084_v58 = vsel %vm613_vm3, %v1061_v45, -inf }
 0x527   : > { %1085 = vmax.xlane.f32.xlu1 %v1084_v58 }
 0x590   : > { %v1089_v47 = vpop.xlane.xlu1 %1088 }
 0x591   : > { %vm1114_vm4 = vcmp.ge.f32.partialorder %v2105_v37, %v1089_v47 }
 0x592   : > { %v1127_v46 = vsel %vm1114_vm4, %v2102_v32, 0.0  ;;  %v1868_v32 = vld [vmem:[%s2948_s5 + $0x8] sm:$0xff]   ;;  %vm1273_vm4 = vcmask 64512  }
 0x594   : > { %v1092_v39 = vpop.xlane.xlu0 %1091 }
 0x595   : > { %vm1115_vm5 = vcmp.ge.f32.partialorder %v2110_v44, %v1092_v39 }
 0x596   : > { %v1128_v28 = vsel %vm1115_vm5, %v2107_v38, 0.0 }
 0x597   : > { %v2716_v62 = vpack.c.bf16 %v1128_v28, %v1127_v46 }
 0x598   : > { %v1095_v26 = vpop.xlane.xlu1 %1094 }
 0x599   : > { %1799 = vmatmul.mubr.msk.bf16.vlgmr.msra.gmra.mrb[0].mxu1 %vm613_vm3, %v2716_v62  ;;  %vm1116_vm6 = vcmp.ge.f32.partialorder %v2119_v55, %v1095_v26  ;;  %v1411_v26 = vlaneseq }
 0x59a   : > { %1815 = vmatpush3.bf16.msra.mxu1 %v1867_v59  ;;  %1802 = vmatprep.mubr.msk.bf16.mxu1 %vm1878_vm0, %v1877_v1  ;;  %v1129_v38 = vsel %vm1116_vm6, %v2114_v49, 0.0 }
 0x59b   : > { %1816 = vmatprep.subr.bf16.mxu1 %v1877_v1 }
 0x59c   : > { %v1098_v37 = vpop.xlane.xlu0 %1097 }
 0x59d   : > { %vm1117_vm7 = vcmp.ge.f32.partialorder %v2124_v60, %v1098_v37 }
 0x59e   : > { %v1130_v44 = vsel %vm1117_vm7, %v2121_v56, 0.0  ;;  %1817 = vmatpush3.bf16.msra.mxu1 %v1868_v32  ;;  %v2814_v32 = vshrl.u32 %v1411_v26, 7 }
 0x59f   : > { %v1138_v16 = vpack.c.bf16 %v1130_v44, %v1129_v38 }
 0x5a0   : > { %v1101_v10 = vpop.xlane.xlu1 %1100 }
 0x5a1   : > { %1803 = vmatmul.mubr.msk.bf16.gmra.mrb[4].mxu1 %vm613_vm3, %v1138_v16  ;;  %vm1118_vm8 = vcmp.ge.f32.partialorder %v2135_v11, %v1101_v10 }
 0x5a2   : > { %v1104_v30 = vpop.xlane.xlu0 %1103  ;;  %1806 = vmatprep.mubr.msk.bf16.mxu1 %vm1878_vm0, %v1877_v1  ;;  %v1131_v60 = vsel %vm1118_vm8, %v2128_v2, 0.0 }
 0x5a3   : > { %vm1119_vm9 = vcmp.ge.f32.partialorder %v2140_v17, %v1104_v30 }
 0x5a4   : > { %v1132_v55 = vsel %vm1119_vm9, %v2137_v14, 0.0 }
 0x5a5   : > { %v1139_v49 = vpack.c.bf16 %v1132_v55, %v1131_v60 }
 0x5a6   : > { %v1071_v48 = vpop.xlane.xlu0 %1070 }
 0x5a7   : > { %vm1108_vm11 = vcmp.ge.f32.partialorder %v2145_v29, %v1071_v48 }
 0x5a8   : > { %v1107_v56 = vpop.xlane.xlu1 %1106  ;;  %v1121_v14 = vsel %vm1108_vm11, %v2132_v6, 0.0 }
 0x5a9   : > { %vm1120_vm10 = vcmp.ge.f32.partialorder %v2161_v52, %v1107_v56  ;;  %1807 = vmatmul.mubr.msk.bf16.gmra.mrb[8].mxu1 %vm613_vm3, %v1139_v49 }
 0x5aa   : > { %1810 = vmatprep.mubr.msk.bf16.mxu1 %vm1878_vm0, %v1877_v1  ;;  %v1133_v11 = vsel %vm1120_vm10, %v2153_v41, 0.0  ;;  %v1077_v33 = vpop.xlane.xlu0 %1076 }
 0x5ab   : > { %v1140_v17 = vpack.c.bf16 %v1133_v11, %v1133_v11  ;;  %vm1110_vm14 = vcmp.ge.f32.partialorder %v2156_v50, %v1077_v33 }
 0x5ac   : > { %v1074_v3 = vpop.xlane.xlu1 %1073  ;;  %v1123_v29 = vsel %vm1110_vm14, %v2147_v31, 0.0 }
 0x5ad   : > { %vm1109_vm12 = vcmp.ge.f32.partialorder %v2166_v13, %v1074_v3  ;;  %v1413_v3 = vadd.s32 8, %v2814_v32 }
 0x5ae   : > { %v1122_v2 = vsel %vm1109_vm12, %v2151_v34, 0.0  ;;  %v1083_v13 = vpop.xlane.xlu0 %1082 }
 0x5af   : > { %v1134_v4 = vpack.c.bf16 %v1122_v2, %v1121_v14  ;;  %vm1112_vm1 = vcmp.ge.f32.partialorder %v2173_v20, %v1083_v13  ;;  %v2833_v2 = vld [vmem:[%s2949_s6] ss:$0 sm:$0xff] }
 0x5b0   : > { %v1080_v52 = vpop.xlane.xlu1 %1079  ;;  %v1125_v50 = vsel %vm1112_vm1, %v2158_v51, 0.0  ;;  %v2788_v51 = vld [vmem:[%s2951_s8] ss:$0 sm:$0xff] }
 0x5b1   : > { %vm1111_vm13 = vcmp.ge.f32.partialorder %v2178_v7, %v1080_v52  ;;  %1787 = vmatmul.mubr.msk.bf16.vlgmr.msra.gmra.mrb[28].mxu0 %vm613_vm3, %v1134_v4  ;;  %1811 = vmatmul.mubr.msk.bf16.gmra.mrb[12].mxu1 %vm613_vm3, %v1140_v17  ;;  %v1414_v52 = vadd.s32 16, %v2814_v32 }
 0x5b2   : > { %1790 = vmatprep.mubr.msk.bf16.mxu0 %vm1878_vm0, %v1877_v1  ;;  %1818 = vmatprep.mubr.msk.bf16.mxu1 %vm1878_vm0, %v1877_v1  ;;  %v1124_v6 = vsel %vm1111_vm13, %v2168_v61, 0.0 }
 0x5b3   : > { %v1135_v41 = vpack.c.bf16 %v1124_v6, %v1123_v29 }
 0x5b4   : > { %v1086_v34 = vpop.xlane.xlu1 %1085 }
 0x5b5   : > { %vm1113_vm15 = vcmp.ge.f32.partialorder %v2187_v21, %v1086_v34 }
 0x5b6   : > { %v1126_v31 = vsel %vm1113_vm15, %v2180_v8, 0.0 }
 0x5b7   : > { %v1136_v61 = vpack.c.bf16 %v1126_v31, %v1125_v50 }
 0x5b9   : > { %1791 = vmatmul.mubr.msk.bf16.gmra.mrb[32].mxu0 %vm613_vm3, %v1135_v41  ;;  %1819 = vmatmul.mubr.msk.bf16.vlgmr.msra.gmra.mrb[16].mxu1 %vm613_vm3, %v1134_v4 }
 0x5ba   : > { %1794 = vmatprep.mubr.msk.bf16.mxu0 %vm1878_vm0, %v1877_v1  ;;  %1822 = vmatprep.mubr.msk.bf16.mxu1 %vm1878_vm0, %v1877_v1 }
 0x5c1   : > { %1795 = vmatmul.mubr.msk.bf16.gmra.mrb[36].mxu0 %vm613_vm3, %v1136_v61  ;;  %1823 = vmatmul.mubr.msk.bf16.gmra.mrb[20].mxu1 %vm613_vm3, %v1135_v41 }
 0x5c2   : > { %1826 = vmatprep.mubr.msk.bf16.mxu1 %vm1878_vm0, %v1877_v1 }
 0x5c9   : > { %1827 = vmatmul.mubr.msk.bf16.gmra.mrb[24].mxu1 %vm613_vm3, %v1136_v61 }
 0x5ca   : > { %1830 = vmatprep.mubr.msk.bf16.mxu1 %vm1878_vm0, %v1877_v1 }
 0x5d1   : > { %1831 = vmatmul.mubr.msk.bf16.gmra.mrb[28].mxu1 %vm613_vm3, %v2716_v62 }
 0x5d2   : > { %1834 = vmatprep.mubr.msk.bf16.mxu1 %vm1878_vm0, %v1877_v1 }
 0x5d9   : > { %1835 = vmatmul.mubr.msk.bf16.gmra.mrb[32].mxu1 %vm613_vm3, %v1138_v16 }
 0x5da   : > { %1838 = vmatprep.mubr.msk.bf16.mxu1 %vm1878_vm0, %v1877_v1 }
 0x5e1   : > { %1839 = vmatmul.mubr.msk.bf16.gmra.mrb[36].mxu1 %vm613_vm3, %v1139_v49  ;;  %v2818_v49 = vstv %s1425_s21 }
 0x5e2   : > { %1842 = vmatprep.mubr.msk.bf16.mxu1 %vm1878_vm0, %v1877_v1  ;;  %v1427_v14 = vadd.s32 %v2818_v49, %v2814_v32 }
 0x5e4   : > { %vm1453_vm0 = vcmp.lt.s32.totalorder %v1427_v14, 392 }
 0x5e9   : > { %1843 = vmatmul.mubr.msk.bf16.gmra.mrb[40].mxu1 %vm613_vm3, %v1140_v17  ;;  %v1428_v17 = vadd.s32 %v2818_v49, %v1413_v3 }
 0x5eb   : > { %vm1454_vm3 = vcmp.lt.s32.totalorder %v1428_v17, 392 }
 0x66c   : > { %v1243_v20 = vpop.f32.mrb[0].mxu1 }
 0x66d   : > { %v1244_v7 = vadd.f32 %v2788_v51, %v1243_v20  ;;  %v1800_v8 = vpop.f32.mrb[1].mxu1 }
 0x66e   : > { %v1246_v21 = vpop.f32.mrb[2].mxu1 }
 0x66f   : > { %1280 = vst.msk [vmem:[%s2793_s28 + $0x30] sm:$0xff] %vm1273_vm4, %v1244_v7  ;;  %v1247_v40 = vadd.f32 %v2788_v51, %v1246_v21  ;;  %v1801_v27 = vpop.f32.mrb[3].mxu1  ;;  %v1676_v21 = vsel %vm1453_vm0, 1.0, %v1877_v1 }
 0x670   : > { %v1415_v27 = vadd.s32 24, %v2814_v32 }
 0x671   : > { %1281 = vst.msk [vmem:[%s2793_s28 + $0x38] sm:$0xff] %vm1273_vm4, %v1247_v40  ;;  %v1429_v40 = vadd.s32 %v2818_v49, %v1414_v52 }
 0x673   : > { %vm1455_vm5 = vcmp.lt.s32.totalorder %v1429_v40, 392 }
 0x674   : > { %v1251_v57 = vpop.f32.mrb[4].mxu1 }
 0x675   : > { %v1252_v15 = vadd.f32 %v2788_v51, %v1251_v57  ;;  %v1804_v12 = vpop.f32.mrb[5].mxu1 }
 0x676   : > { %v1254_v5 = vpop.f32.mrb[6].mxu1  ;;  %v1677_v12 = vsel %vm1454_vm3, 1.0, %v1877_v1 }
 0x677   : > { %1282 = vst.msk [vmem:[%s2793_s28 + $0x40] sm:$0xff] %vm1273_vm4, %v1252_v15  ;;  %v1255_v45 = vadd.f32 %v2788_v51, %v1254_v5  ;;  %v1805_v58 = vpop.f32.mrb[7].mxu1 }
 0x679   : > { %1283 = vst.msk [vmem:[%s2793_s28 + $0x48] sm:$0xff] %vm1273_vm4, %v1255_v45 }
 0x67c   : > { %v1259_v47 = vpop.f32.mrb[8].mxu1 }
 0x67d   : > { %v1260_v39 = vadd.f32 %v2788_v51, %v1259_v47  ;;  %v1808_v46 = vpop.f32.mrb[9].mxu1 }
 0x67e   : > { %v1262_v28 = vpop.f32.mrb[10].mxu1  ;;  %v1416_v46 = vadd.s32 32, %v2814_v32 }
 0x67f   : > { %1284 = vst.msk [vmem:[%s2793_s28 + $0x50] sm:$0xff] %vm1273_vm4, %v1260_v39  ;;  %v1263_v59 = vadd.f32 %v2788_v51, %v1262_v28  ;;  %v1809_v62 = vpop.f32.mrb[11].mxu1  ;;  %v1430_v39 = vadd.s32 %v2818_v49, %v1415_v27 }
 0x681   : > { %1285 = vst.msk [vmem:[%s2793_s28 + $0x58] sm:$0xff] %vm1273_vm4, %v1263_v59  ;;  %vm1456_vm6 = vcmp.lt.s32.totalorder %v1430_v39, 392 }
 0x684   : > { %v1219_v37 = vpop.f32.mrb[28].mxu0  ;;  %v1267_v38 = vpop.f32.mrb[12].mxu1 }
 0x685   : > { %v1220_v44 = vadd.f32 %v2788_v51, %v1219_v37  ;;  %v1268_v16 = vadd.f32 %v2788_v51, %v1267_v38  ;;  %v1788_v10 = vpop.f32.mrb[29].mxu0  ;;  %v1812_v30 = vpop.f32.mrb[13].mxu1 }
 0x686   : > { %v1222_v55 = vpop.f32.mrb[30].mxu0  ;;  %v1270_v60 = vpop.f32.mrb[14].mxu1  ;;  %v1417_v30 = vadd.s32 40, %v2814_v32 }
 0x687   : > { %1274 = vst.msk [vmem:[%s2793_s28] sm:$0xff] %vm1273_vm4, %v1220_v44  ;;  %1286 = vst.msk [vmem:[%s2793_s28 + $0x60] sm:$0xff] %vm1273_vm4, %v1268_v16  ;;  %v1223_v48 = vadd.f32 %v2788_v51, %v1222_v55  ;;  %v1789_v56 = vpop.f32.mrb[31].mxu0  ;;  %v1813_v11 = vpop.f32.mrb[15].mxu1  ;;  %v1678_v55 = vsel %vm1455_vm5, 1.0, %v1877_v1 }
 0x688   : > { %v2964_v11 = vmax.f32 %v1997_v24, 0.0  ;;  %v1432_v52 = vadd.s32 %v2818_v49, %v1417_v30 }
 0x689   : > { %1275 = vst.msk [vmem:[%s2793_s28 + $0x8] sm:$0xff] %vm1273_vm4, %v1223_v48 }
 0x68a   : > { %vm1458_vm8 = vcmp.lt.s32.totalorder %v1432_v52, 392  ;;  %v2969_v52 = vmax.f32 %v2036_v43, 0.0 }
 0x68c   : > { %v1227_v4 = vpop.f32.mrb[32].mxu0  ;;  %v1344_v33 = vpop.f32.mrb[16].mxu1 }
 0x68d   : > { %v1228_v6 = vadd.f32 %v2788_v51, %v1227_v4  ;;  %v1345_v29 = vadd.f32 %v2833_v2, %v1344_v33  ;;  %v1792_v34 = vpop.f32.mrb[33].mxu0  ;;  %v1820_v41 = vpop.f32.mrb[17].mxu1  ;;  %v1679_v33 = vsel %vm1456_vm6, 1.0, %v1877_v1 }
 0x68e   : > { %v1230_v13 = vpop.f32.mrb[34].mxu0  ;;  %v1347_v31 = vpop.f32.mrb[18].mxu1  ;;  %v1418_v41 = vadd.s32 48, %v2814_v32 }
 0x68f   : > { %1276 = vst.msk [vmem:[%s2793_s28 + $0x10] sm:$0xff] %vm1273_vm4, %v1228_v6  ;;  %v1398_v50 = vmax.f32 %v1345_v29, 0.0  ;;  %v1231_v61 = vadd.f32 %v2788_v51, %v1230_v13  ;;  %v1348_v20 = vadd.f32 %v2833_v2, %v1347_v31  ;;  %v1793_v7 = vpop.f32.mrb[35].mxu0  ;;  %v1821_v8 = vpop.f32.mrb[19].mxu1  ;;  %v2965_v6 = vmax.f32 %v2000_v25, 0.0 }
 0x691   : > { %v1440_v57 = vsub.f32 %v439_v22, %v1398_v50  ;;  %1277 = vst.msk [vmem:[%s2793_s28 + $0x18] sm:$0xff] %vm1273_vm4, %v1231_v61  ;;  %v1399_v15 = vmax.f32 %v1348_v20, 0.0  ;;  %v1419_v20 = vadd.s32 56, %v2814_v32 }
 0x693   : > { %v1492_v5 = vmul.f32 %v1676_v21, %v1440_v57  ;;  %v1441_v45 = vsub.f32 %v440_v23, %v1399_v15  ;;  %v1433_v15 = vadd.s32 %v2818_v49, %v1418_v41  ;;  %v1434_v39 = vadd.s32 %v2818_v49, %v1419_v20 }
 0x694   : > { %v1235_v58 = vpop.f32.mrb[36].mxu0  ;;  %v1352_v47 = vpop.f32.mrb[20].mxu1 }
 0x695   : > { %v1505_v28 = vmul.f32 %v1492_v5, %v1492_v5  ;;  %v1493_v18 = vmul.f32 %v1677_v12, %v1441_v45  ;;  %v1236_v22 = vadd.f32 %v2788_v51, %v1235_v58  ;;  %v1353_v59 = vadd.f32 %v2833_v2, %v1352_v47  ;;  %v1796_v62 = vpop.f32.mrb[37].mxu0  ;;  %v1824_v26 = vpop.f32.mrb[21].mxu1 }
 0x696   : > { %v1238_v37 = vpop.f32.mrb[38].mxu0  ;;  %v1355_v19 = vpop.f32.mrb[22].mxu1  ;;  %v2966_v12 = vmax.f32 %v2019_v35, 0.0  ;;  %v1681_v47 = vsel %vm1458_vm8, 1.0, %v1877_v1  ;;  %vm1459_vm9 = vcmp.lt.s32.totalorder %v1433_v15, 392  ;;  %vm1460_vm10 = vcmp.lt.s32.totalorder %v1434_v39, 392 }
 0x697   : > { %v1506_v38 = vmul.f32 %v1493_v18, %v1493_v18  ;;  %1278 = vst.msk [vmem:[%s2793_s28 + $0x20] sm:$0xff] %vm1273_vm4, %v1236_v22  ;;  %v1400_v23 = vmax.f32 %v1353_v59, 0.0  ;;  %v1239_v44 = vadd.f32 %v2788_v51, %v1238_v37  ;;  %v1797_v16 = vpop.f32.mrb[39].mxu0  ;;  %v1825_v10 = vpop.f32.mrb[23].mxu1  ;;  %v1356_v60 = vadd.f32 %v2833_v2, %v1355_v19 }
 0x698   : > { %v1518_v48 = vsel %vm486_vm2, %v1505_v28, 0.0  ;;  %v1431_v51 = vadd.s32 %v2818_v49, %v1416_v46  ;;  %v2967_v18 = vmax.f32 %v2022_v36, 0.0  ;;  %v1420_v19 = vadd.s32 64, %v2814_v32 }
 0x699   : > { %v1519_v56 = vsel %vm486_vm2, %v1506_v38, 0.0  ;;  %v1442_v3 = vsub.f32 %v2964_v11, %v1400_v23  ;;  %1279 = vst.msk [vmem:[%s2793_s28 + $0x28] sm:$0xff] %vm1273_vm4, %v1239_v44  ;;  %v1401_v17 = vmax.f32 %v1356_v60, 0.0  ;;  %v1421_v23 = vadd.s32 72, %v2814_v32 }
 0x69a   : > { %v1520_v14 = vadd.f32 %v1519_v56, %v1518_v48  ;;  %vm1457_vm7 = vcmp.lt.s32.totalorder %v1431_v51, 392  ;;  %v1682_v60 = vsel %vm1459_vm9, 1.0, %v1877_v1  ;;  %v2968_v56 = vmax.f32 %v2033_v42, 0.0 }
 0x69b   : > { %v1494_v4 = vmul.f32 %v1678_v55, %v1442_v3  ;;  %v1443_v29 = vsub.f32 %v2965_v6, %v1401_v17  ;;  %v1680_v57 = vsel %vm1457_vm7, 1.0, %v1877_v1  ;;  %v1435_v51 = vadd.s32 %v2818_v49, %v1420_v19 }
 0x69c   : > { %v1360_v34 = vpop.f32.mrb[24].mxu1  ;;  %v1683_v17 = vsel %vm1460_vm10, 1.0, %v1877_v1  ;;  %v2971_v39 = vmax.f32 %v2058_v54, 0.0 }
 0x69d   : > { %v1507_v13 = vmul.f32 %v1494_v4, %v1494_v4  ;;  %v1361_v24 = vadd.f32 %v2833_v2, %v1360_v34  ;;  %v1828_v31 = vpop.f32.mrb[25].mxu1  ;;  %v1495_v50 = vmul.f32 %v1679_v33, %v1443_v29  ;;  %v1436_v4 = vadd.s32 %v2818_v49, %v1421_v23 }
 0x69e   : > { %v1363_v61 = vpop.f32.mrb[26].mxu1  ;;  %v1422_v34 = vadd.s32 80, %v2814_v32  ;;  %vm1461_vm11 = vcmp.lt.s32.totalorder %v1435_v51, 392 }
 0x69f   : > { %v1521_v7 = vsel %vm486_vm2, %v1507_v13, 0.0  ;;  %v1402_v8 = vmax.f32 %v1361_v24, 0.0  ;;  %v1364_v21 = vadd.f32 %v2833_v2, %v1363_v61  ;;  %v1829_v25 = vpop.f32.mrb[27].mxu1  ;;  %v1508_v27 = vmul.f32 %v1495_v50, %v1495_v50 }
 0x6a0   : > { %v1522_v40 = vadd.f32 %v1521_v7, %v1520_v14  ;;  %vm1462_vm12 = vcmp.lt.s32.totalorder %v1436_v4, 392  ;;  %v1423_v50 = vadd.s32 88, %v2814_v32  ;;  %v1684_v25 = vsel %vm1461_vm11, 1.0, %v1877_v1 }
 0x6a1   : > { %v1444_v5 = vsub.f32 %v2966_v12, %v1402_v8  ;;  %v1403_v45 = vmax.f32 %v1364_v21, 0.0  ;;  %v1523_v58 = vsel %vm486_vm2, %v1508_v27, 0.0 }
 0x6a2   : > { %v1524_v46 = vadd.f32 %v1523_v58, %v1522_v40  ;;  %v1437_v40 = vadd.s32 %v2818_v49, %v1422_v34  ;;  %v1438_v58 = vadd.s32 %v2818_v49, %v1423_v50 }
 0x6a3   : > { %v1496_v28 = vmul.f32 %v1680_v57, %v1444_v5  ;;  %v1445_v22 = vsub.f32 %v2967_v18, %v1403_v45  ;;  %v2970_v57 = vmax.f32 %v2055_v53, 0.0  ;;  %v1685_v45 = vsel %vm1462_vm12, 1.0, %v1877_v1 }
 0x6a4   : > { %v1368_v59 = vpop.f32.mrb[28].mxu1  ;;  %vm1463_vm13 = vcmp.lt.s32.totalorder %v1437_v40, 392  ;;  %v1424_v53 = vadd.s32 96, %v2814_v32  ;;  %vm1464_vm14 = vcmp.lt.s32.totalorder %v1438_v58, 392 }
 0x6a5   : > { %v1509_v62 = vmul.f32 %v1496_v28, %v1496_v28  ;;  %v1497_v26 = vmul.f32 %v1681_v47, %v1445_v22  ;;  %v1369_v37 = vadd.f32 %v2833_v2, %v1368_v59  ;;  %v1832_v35 = vpop.f32.mrb[29].mxu1 }
 0x6a6   : > { %v1371_v38 = vpop.f32.mrb[30].mxu1  ;;  %v1439_v32 = vadd.s32 %v2818_v49, %v1424_v53 }
 0x6a7   : > { %v1525_v44 = vsel %vm486_vm2, %v1509_v62, 0.0  ;;  %v1510_v16 = vmul.f32 %v1497_v26, %v1497_v26  ;;  %v1404_v10 = vmax.f32 %v1369_v37, 0.0  ;;  %v1372_v36 = vadd.f32 %v2833_v2, %v1371_v38  ;;  %v1833_v30 = vpop.f32.mrb[31].mxu1 }
 0x6a8   : > { %v1526_v55 = vadd.f32 %v1525_v44, %v1524_v46  ;;  %v1686_v44 = vsel %vm1463_vm13, 1.0, %v1877_v1  ;;  %vm1465_vm15 = vcmp.lt.s32.totalorder %v1439_v32, 392 }
 0x6a9   : > { %v1527_v48 = vsel %vm486_vm2, %v1510_v16, 0.0  ;;  %v1446_v11 = vsub.f32 %v2968_v56, %v1404_v10  ;;  %v1405_v3 = vmax.f32 %v1372_v36, 0.0  ;;  %v2972_v10 = vmax.f32 %v2073_v63, 0.0 }
 0x6aa   : > { %v1528_v14 = vadd.f32 %v1527_v48, %v1526_v55  ;;  %v2973_v56 = vmax.f32 %v2076_v0, 0.0 }
 0x6ab   : > { %v1498_v33 = vmul.f32 %v1682_v60, %v1446_v11  ;;  %v1447_v6 = vsub.f32 %v2969_v52, %v1405_v3  ;;  %v1687_v60 = vsel %vm1464_vm14, 1.0, %v1877_v1 }
 0x6ac   : > { %v1376_v29 = vpop.f32.mrb[32].mxu1 }
 0x6ad   : > { %v1511_v41 = vmul.f32 %v1498_v33, %v1498_v33  ;;  %v1499_v13 = vmul.f32 %v1683_v17, %v1447_v6  ;;  %v1377_v42 = vadd.f32 %v2833_v2, %v1376_v29  ;;  %v1836_v24 = vpop.f32.mrb[33].mxu1  ;;  %v1688_v29 = vsel %vm1465_vm15, 1.0, %v1877_v1 }
 0x6ae   : > { %v1379_v31 = vpop.f32.mrb[34].mxu1 }
 0x6af   : > { %v1529_v61 = vsel %vm486_vm2, %v1511_v41, 0.0  ;;  %v1512_v20 = vmul.f32 %v1499_v13, %v1499_v13  ;;  %v1406_v7 = vmax.f32 %v1377_v42, 0.0  ;;  %v1380_v43 = vadd.f32 %v2833_v2, %v1379_v31  ;;  %v1837_v8 = vpop.f32.mrb[35].mxu1 }
 0x6b0   : > { %v1530_v21 = vadd.f32 %v1529_v61, %v1528_v14 }
 0x6b1   : > { %v1531_v27 = vsel %vm486_vm2, %v1512_v20, 0.0  ;;  %v1448_v15 = vsub.f32 %v2970_v57, %v1406_v7  ;;  %v1407_v12 = vmax.f32 %v1380_v43, 0.0 }
 0x6b2   : > { %v1532_v5 = vadd.f32 %v1531_v27, %v1530_v21 }
 0x6b3   : > { %v1500_v47 = vmul.f32 %v1684_v25, %v1448_v15  ;;  %v1449_v46 = vsub.f32 %v2971_v39, %v1407_v12 }
 0x6b4   : > { %v1384_v28 = vpop.f32.mrb[36].mxu1 }
 0x6b5   : > { %v1513_v18 = vmul.f32 %v1500_v47, %v1500_v47  ;;  %v1501_v22 = vmul.f32 %v1685_v45, %v1449_v46  ;;  %v1385_v59 = vadd.f32 %v2833_v2, %v1384_v28  ;;  %v1840_v62 = vpop.f32.mrb[37].mxu1 }
 0x6b6   : > { %v1387_v26 = vpop.f32.mrb[38].mxu1 }
 0x6b7   : > { %v1533_v37 = vsel %vm486_vm2, %v1513_v18, 0.0  ;;  %v1514_v35 = vmul.f32 %v1501_v22, %v1501_v22  ;;  %v1408_v19 = vmax.f32 %v1385_v59, 0.0  ;;  %v1388_v38 = vadd.f32 %v2833_v2, %v1387_v26  ;;  %v1841_v23 = vpop.f32.mrb[39].mxu1 }
 0x6b8   : > { %v1534_v54 = vadd.f32 %v1533_v37, %v1532_v5 }
 0x6b9   : > { %v1535_v16 = vsel %vm486_vm2, %v1514_v35, 0.0  ;;  %v1450_v36 = vsub.f32 %v2972_v10, %v1408_v19  ;;  %v1409_v30 = vmax.f32 %v1388_v38, 0.0 }
 0x6ba   : > { %v1536_v55 = vadd.f32 %v1535_v16, %v1534_v54 }
 0x6bb   : > { %v1502_v48 = vmul.f32 %v1686_v44, %v1450_v36  ;;  %v1451_v11 = vsub.f32 %v2973_v56, %v1409_v30 }
 0x6bc   : > { %v1392_v3 = vpop.f32.mrb[40].mxu1 }
 0x6bd   : > { %v1515_v51 = vmul.f32 %v1502_v48, %v1502_v48  ;;  %v1503_v14 = vmul.f32 %v1687_v60, %v1451_v11  ;;  %v1393_v17 = vadd.f32 %v2833_v2, %v1392_v3  ;;  %v1844_v4 = vpop.f32.mrb[41].mxu1 }
 0x6be   : > { %v1395_v33 = vpop.f32.mrb[42].mxu1 }
 0x6bf   : > { %v1537_v63 = vsel %vm486_vm2, %v1515_v51, 0.0  ;;  %v1516_v52 = vmul.f32 %v1503_v14, %v1503_v14  ;;  %v1410_v6 = vmax.f32 %v1393_v17, 0.0  ;;  %v1845_v49 = vpop.f32.mrb[43].mxu1 }
 0x6c0   : > { %v1538_v34 = vadd.f32 %v1537_v63, %v1536_v55 }
 0x6c1   : > { %v1452_v41 = vsub.f32 %v2090_v9, %v1410_v6  ;;  %v1539_v0 = vsel %vm486_vm2, %v1516_v52, 0.0 }
 0x6c2   : > { %v1540_v13 = vadd.f32 %v1539_v0, %v1538_v34 }
 0x6c3   : > { %v1504_v42 = vmul.f32 %v1688_v29, %v1452_v41 }
 0x6c5   : > { %v1517_v2 = vmul.f32 %v1504_v42, %v1504_v42 }
 0x6c7   : > { %v1541_v24 = vsel %vm486_vm2, %v1517_v2, 0.0 }
 0x6c8   : > { %v1542_v31 = vadd.f32 %v1541_v24, %v1540_v13 }
 0x6ca   : > { %1543 = vadd.xlane.f32.xlu0 %v1542_v31 }
 0x757   : > { %v1544_v50 = vpop.xlane.xlu0 %1543 }
 0x758   : > { %v1545_v61 = vrot.slane %v1544_v50, 4 }
 0x75a   : > { %v1546_v20 = vadd.f32 %v1545_v61, %v1544_v50 }
 0x75c   : > { %v1547_v7 = vrot.slane %v1546_v20, 2 }
 0x75e   : > { %v1548_v43 = vadd.f32 %v1547_v7, %v1546_v20 }
 0x760   : > { %v1549_v1 = vrot.slane %v1548_v43, 1 }
 0x762   : > { %v1550_v8 = vadd.f32 %v1549_v1, %v1548_v43 }
 0x764   : > { %1850 = vpush %v1550_v8 }
 0x795   : > { %s1851_s16 = spop %1850 }
 0x796   : > { %v1552_v9 = vstv %s1851_s16 }
 0x797   : > { %1554 = vst [vmem:[%s371_s15] sm:$0x1] %v1552_v9 }
 0x798 PF: > { %s21_s13 = sadd.s32 1, %s1875_s13  }
 0x799   : > { %p18_p5 = scmp.ge.s32.totalorder %s21_s13, 6  }
 0x79b   :  { %20 = sbr.rel (!%p18_p5) target bundleno = 1 (0x1), region = 98 }

</bundles_post_ra>
